<compile_context>
chip_gen: v6e
topology: v6e:2x2x1
jax: 0.10.0
libtpu: 0.0.40
codegen_flags: <defaults>
</compile_context>

<pallas_src>
import functools
import math

import jax
import jax.numpy as jnp
from jax import lax
from jax.experimental import pallas as pl
from jax.experimental.pallas import tpu as pltpu

HIDDEN1 = 128   # fc1 / fc3 / lstm / attention width
HIDDEN2 = 64    # fc2 width
EMBED = 128     # lstm hidden size == attention embed dim
GATE = 4 * EMBED


def mctsnet_kernel(x_ref, wsq_ref, wlstm_ref, bias_ref, out_ref, *, num_actions):
    f32 = jnp.float32
    bf16 = jnp.bfloat16
    H = EMBED
    B = x_ref.shape[0]

    # ---- bias slab slices (all 128-aligned) ----
    b1 = bias_ref[:, 0:H]
    b2 = bias_ref[:, H:2 * H]
    b3 = bias_ref[:, 2 * H:3 * H]
    b_fold = bias_ref[:, 3 * H:4 * H]
    b_lstm = bias_ref[:, 4 * H:4 * H + GATE]

    # ---- consolidated weight slabs (bf16 operands, f32 MXU accumulate) ----
    w1 = wsq_ref[0:H, :]
    w2 = wsq_ref[H:2 * H, :]
    w3 = wsq_ref[2 * H:3 * H, :]
    w_fold = wsq_ref[3 * H:4 * H, :]
    w_ih = wlstm_ref[0:H, :]
    w_hh = wlstm_ref[H:2 * H, :]

    # ---- MLP trunk (Dropout is identity at inference).  x is already bf16 and
    #      lane-padded to 128 in the wrapper; fc2/fc3 are padded to 128 lanes,
    #      so every activation is lane-dense. ----
    x = x_ref[...]
    h1 = jnp.maximum(jnp.dot(x, w1, preferred_element_type=f32) + b1, 0.0)
    h2 = jnp.maximum(jnp.dot(h1.astype(bf16), w2, preferred_element_type=f32) + b2, 0.0)
    h3 = jnp.maximum(jnp.dot(h2.astype(bf16), w3, preferred_element_type=f32) + b3, 0.0)

    # ---- LSTM over the B rows (PyTorch unbatched-sequence semantics). ----
    # Input-side gates hoisted out of the recurrence: one batched matmul, kept
    # entirely in vregs (no VMEM scratch).
    gx = jnp.dot(h3.astype(bf16), w_ih, preferred_element_type=f32) + b_lstm   # (B, 4H)

    h = jnp.zeros((1, H), f32)
    c = jnp.zeros((1, H), f32)
    lstm_out = jnp.zeros((B, H), f32)
    row = lax.broadcasted_iota(jnp.int32, (B, H), 0)
    # Fully unrolled: B is static and tiny; select-stacking keeps the recurrent
    # state and outputs in vregs (no VMEM store/load on the critical path).
    # TODO(synk): W_hh could be kept staged in the MXU weight registers across
    # steps via pltpu.matmul_push_rhs / matmul_acc_lhs; left to the compiler
    # (jnp.dot) for robustness.
    for t in range(B):
        gates = gx[t:t + 1, :] + jnp.dot(h.astype(bf16), w_hh,
                                         preferred_element_type=f32)           # (1, 4H)
        i_g = jax.nn.sigmoid(gates[:, 0:H])
        f_g = jax.nn.sigmoid(gates[:, H:2 * H])
        g_g = jnp.tanh(gates[:, 2 * H:3 * H])
        o_g = jax.nn.sigmoid(gates[:, 3 * H:4 * H])
        c = f_g * c + i_g * g_g
        h = o_g * jnp.tanh(c)
        lstm_out = jnp.where(row == t, h, lstm_out)

    # ---- folded (attention out_proj∘v_proj) ∘ [policy|value] head:
    #      ONE lane-dense (B,128) matmul instead of two dependent ones. ----
    raw = jnp.dot(lstm_out.astype(bf16), w_fold, preferred_element_type=f32) + b_fold

    lane = lax.broadcasted_iota(jnp.int32, raw.shape, 1)
    is_pol = lane < num_actions
    masked = jnp.where(is_pol, raw, jnp.float32(-1e30))
    m = jnp.max(masked, axis=-1, keepdims=True)
    e = jnp.where(is_pol, jnp.exp(masked - m), 0.0)
    denom = jnp.sum(e, axis=-1, keepdims=True)
    policy = e * pl.reciprocal(denom, approx=True)

    # Lanes [0, A): policy; lane A: value; lanes > A: exact zeros (zero-padded
    # folded weight & bias).  Single lane-dense store, split in the wrapper.
    out_ref[...] = jnp.where(is_pol, policy, raw)


def init_params(key, input_size, num_actions):
    """Deterministic PyTorch-style uniform(-1/sqrt(fan_in), 1/sqrt(fan_in)) init."""
    def linear(k, out_f, in_f):
        k1, k2 = jax.random.split(k)
        bound = 1.0 / math.sqrt(in_f)
        w = jax.random.uniform(k1, (out_f, in_f), jnp.float32, -bound, bound)
        b = jax.random.uniform(k2, (out_f,), jnp.float32, -bound, bound)
        return w, b

    keys = jax.random.split(key, 10)
    p = {}
    p["w1"], p["b1"] = linear(keys[0], HIDDEN1, input_size)
    p["w2"], p["b2"] = linear(keys[1], HIDDEN2, HIDDEN1)
    p["w3"], p["b3"] = linear(keys[2], HIDDEN1, HIDDEN2)
    # LSTM(128 -> 128), single layer (dropout arg has no effect with 1 layer).
    p["w_ih"], p["b_ih"] = linear(keys[3], 4 * EMBED, EMBED)
    p["w_hh"], p["b_hh"] = linear(keys[4], 4 * EMBED, EMBED)
    # Attention: only the V-projection slice of in_proj and out_proj matter
    # for seq_len == 1 (Q/K cancel through the singleton softmax).
    p["w_v"], p["b_v"] = linear(keys[5], EMBED, EMBED)
    p["w_o"], p["b_o"] = linear(keys[6], EMBED, EMBED)
    p["wp"], p["bp"] = linear(keys[7], num_actions, EMBED)
    p["wval"], p["bval"] = linear(keys[8], 1, EMBED)
    return p


def prepare_params(p):
    """One-time host-side slab construction (transposes, pads, folds, bf16 casts).

    Kept out of the per-call path so the jitted forward is just
    pad + pallas_call + two slices.
    """
    f32 = jnp.float32
    bf16 = jnp.bfloat16
    H = EMBED
    A = p["wp"].shape[0]
    in_f = p["w1"].shape[1]
    assert A + 1 <= H, "fused head assumes num_actions + 1 <= 128"
    assert in_f <= H, "input_size must be <= 128 for the folded w1 slab"

    # fc1 zero-padded on the input side (padded x lanes hit zero rows).
    w1p = jnp.zeros((H, H), f32).at[:in_f, :].set(p["w1"].T)
    # fc2/fc3 zero-padded to 128 lanes (padded activations are relu(0)=0 and
    # hit zero rows of the next weight -> exactly equivalent).
    w2p = jnp.zeros((H, H), f32).at[:, :HIDDEN2].set(p["w2"].T)
    b2p = jnp.zeros((H,), f32).at[:HIDDEN2].set(p["b2"])
    w3p = jnp.zeros((H, H), f32).at[:HIDDEN2, :].set(p["w3"].T)

    # Seq-len-1 attention: out_proj(v_proj(x)) folded into a single affine map.
    w_attn = p["w_v"].T @ p["w_o"].T
    b_attn = p["b_v"] @ p["w_o"].T + p["b_o"]

    # Fused, lane-padded [policy | value | 0...] head.
    w_heads = (jnp.zeros((H, H), f32)
               .at[:, :A].set(p["wp"].T)
               .at[:, A].set(p["wval"][0]))
    b_heads = (jnp.zeros((H,), f32)
               .at[:A].set(p["bp"])
               .at[A].set(p["bval"][0]))

    # Fold the attention projection into the heads: one matmul in the kernel.
    w_fold = w_attn @ w_heads
    b_fold = b_attn @ w_heads + b_heads

    # Consolidated slabs: bf16 MXU operands (f32 accumulation in-kernel).
    wsq = jnp.concatenate([w1p, w2p, w3p, w_fold], axis=0).astype(bf16)        # (512, 128)
    wlstm = jnp.concatenate([p["w_ih"].T, p["w_hh"].T], axis=0).astype(bf16)   # (256, 512)
    # One bias slab with 128-aligned segments, kept f32 for VPU/EUP math.
    bias = jnp.concatenate(
        [p["b1"], b2p, p["b3"], b_fold, p["b_ih"] + p["b_hh"]]).reshape(1, -1)  # (1, 1024)

    return {"wsq": wsq, "wlstm": wlstm, "bias": bias, "num_actions": A}


@functools.partial(jax.jit, static_argnames=("num_actions",))
def _mctsnet_call(x, wsq, wlstm, bias, *, num_actions):
    B, in_f = x.shape
    # bf16-cast + lane-pad x once, in the same jit as the kernel call.
    xp = jnp.zeros((B, EMBED), jnp.bfloat16).at[:, :in_f].set(x.astype(jnp.bfloat16))

    vmem = pl.BlockSpec(memory_space=pltpu.MemorySpace.VMEM)
    out = pl.pallas_call(
        functools.partial(mctsnet_kernel, num_actions=num_actions),
        out_shape=jax.ShapeDtypeStruct((B, EMBED), jnp.float32),
        in_specs=[vmem] * 4,
        out_specs=vmem,
    )(xp, wsq, wlstm, bias)
    return out[:, :num_actions], out[:, num_actions:num_actions + 1]


def mctsnet_forward(x, prepared):
    return _mctsnet_call(x, prepared["wsq"], prepared["wlstm"], prepared["bias"],
                         num_actions=prepared["num_actions"])


if __name__ == "__main__":
    B = 8
    INPUT_SIZE = 32
    NUM_ACTIONS = 8

    key = jax.random.PRNGKey(0)
    params = init_params(key, INPUT_SIZE, NUM_ACTIONS)
    prepared = prepare_params(params)
    x = jax.random.normal(jax.random.fold_in(key, 999), (B, INPUT_SIZE),
                          dtype=jnp.float32)

    policy, value = mctsnet_forward(x, prepared)
    jax.block_until_ready((policy, value))

    assert policy.shape == (B, NUM_ACTIONS)
    assert value.shape == (B, 1)
    # Policy rows must sum to 1 (softmax); tolerance loosened for the
    # approximate EUP reciprocal + bf16 MXU operands.
    assert bool(jnp.all(jnp.abs(jnp.sum(policy, axis=-1) - 1.0) < 1e-2))
    assert bool(jnp.all(jnp.isfinite(value)))
    print("KERNEL_OK")
</pallas_src>

<mosaic_0001>
module attributes {stable_mosaic.version = 11 : i64} {
  func.func @mctsnet_kernel(%arg0: memref<8x128xbf16, #tpu.memory_space<vmem>>, %arg1: memref<512x128xbf16, #tpu.memory_space<vmem>>, %arg2: memref<256x512xbf16, #tpu.memory_space<vmem>>, %arg3: memref<1x1024xf32, #tpu.memory_space<vmem>>, %arg4: memref<8x128xf32, #tpu.memory_space<vmem>>) attributes {dimension_semantics = [], scalar_prefetch = 0 : i64, scratch_operands = 0 : i64, tpu.core_type = #tpu.core_type<tc>} {
    %c0 = arith.constant 0 : index
    %c0_0 = arith.constant 0 : index
    %0 = vector.load %arg3[%c0, %c0_0] : memref<1x1024xf32, #tpu.memory_space<vmem>>, vector<1x128xf32>
    %c0_1 = arith.constant 0 : index
    %c128 = arith.constant 128 : index
    %1 = vector.load %arg3[%c0_1, %c128] : memref<1x1024xf32, #tpu.memory_space<vmem>>, vector<1x128xf32>
    %c0_2 = arith.constant 0 : index
    %c256 = arith.constant 256 : index
    %2 = vector.load %arg3[%c0_2, %c256] : memref<1x1024xf32, #tpu.memory_space<vmem>>, vector<1x128xf32>
    %c0_3 = arith.constant 0 : index
    %c384 = arith.constant 384 : index
    %3 = vector.load %arg3[%c0_3, %c384] : memref<1x1024xf32, #tpu.memory_space<vmem>>, vector<1x128xf32>
    %c0_4 = arith.constant 0 : index
    %c512 = arith.constant 512 : index
    %4 = vector.load %arg3[%c0_4, %c512] : memref<1x1024xf32, #tpu.memory_space<vmem>>, vector<1x512xf32>
    %c0_5 = arith.constant 0 : index
    %c0_6 = arith.constant 0 : index
    %5 = vector.load %arg1[%c0_5, %c0_6] : memref<512x128xbf16, #tpu.memory_space<vmem>>, vector<128x128xbf16>
    %c128_7 = arith.constant 128 : index
    %c0_8 = arith.constant 0 : index
    %6 = vector.load %arg1[%c128_7, %c0_8] : memref<512x128xbf16, #tpu.memory_space<vmem>>, vector<128x128xbf16>
    %c256_9 = arith.constant 256 : index
    %c0_10 = arith.constant 0 : index
    %7 = vector.load %arg1[%c256_9, %c0_10] : memref<512x128xbf16, #tpu.memory_space<vmem>>, vector<128x128xbf16>
    %c384_11 = arith.constant 384 : index
    %c0_12 = arith.constant 0 : index
    %8 = vector.load %arg1[%c384_11, %c0_12] : memref<512x128xbf16, #tpu.memory_space<vmem>>, vector<128x128xbf16>
    %c0_13 = arith.constant 0 : index
    %c0_14 = arith.constant 0 : index
    %9 = vector.load %arg2[%c0_13, %c0_14] : memref<256x512xbf16, #tpu.memory_space<vmem>>, vector<128x512xbf16>
    %c128_15 = arith.constant 128 : index
    %c0_16 = arith.constant 0 : index
    %10 = vector.load %arg2[%c128_15, %c0_16] : memref<256x512xbf16, #tpu.memory_space<vmem>>, vector<128x512xbf16>
    %c0_17 = arith.constant 0 : index
    %c0_18 = arith.constant 0 : index
    %11 = vector.load %arg0[%c0_17, %c0_18] : memref<8x128xbf16, #tpu.memory_space<vmem>>, vector<8x128xbf16>
    %cst = arith.constant dense<0.000000e+00> : vector<8x128xf32>
    %12 = tpu.matmul %11, %5, %cst {dimension_numbers = #tpu.dot_dimension_numbers<[1], [0], [0], [1], [0, 0, 1, 1], [], []>} : vector<8x128xbf16>, vector<128x128xbf16>, vector<8x128xf32> -> vector<8x128xf32>
    %13 = vector.broadcast %0 : vector<1x128xf32> to vector<8x128xf32>
    %14 = arith.addf %12, %13 : vector<8x128xf32>
    %cst_19 = arith.constant 0.000000e+00 : f32
    %15 = vector.broadcast %cst_19 : f32 to vector<8x128xf32>
    %16 = arith.maximumf %14, %15 : vector<8x128xf32>
    %17 = arith.truncf %16 : vector<8x128xf32> to vector<8x128xbf16>
    %cst_20 = arith.constant dense<0.000000e+00> : vector<8x128xf32>
    %18 = tpu.matmul %17, %6, %cst_20 {dimension_numbers = #tpu.dot_dimension_numbers<[1], [0], [0], [1], [0, 0, 1, 1], [], []>} : vector<8x128xbf16>, vector<128x128xbf16>, vector<8x128xf32> -> vector<8x128xf32>
    %19 = vector.broadcast %1 : vector<1x128xf32> to vector<8x128xf32>
    %20 = arith.addf %18, %19 : vector<8x128xf32>
    %cst_21 = arith.constant 0.000000e+00 : f32
    %21 = vector.broadcast %cst_21 : f32 to vector<8x128xf32>
    %22 = arith.maximumf %20, %21 : vector<8x128xf32>
    %23 = arith.truncf %22 : vector<8x128xf32> to vector<8x128xbf16>
    %cst_22 = arith.constant dense<0.000000e+00> : vector<8x128xf32>
    %24 = tpu.matmul %23, %7, %cst_22 {dimension_numbers = #tpu.dot_dimension_numbers<[1], [0], [0], [1], [0, 0, 1, 1], [], []>} : vector<8x128xbf16>, vector<128x128xbf16>, vector<8x128xf32> -> vector<8x128xf32>
    %25 = vector.broadcast %2 : vector<1x128xf32> to vector<8x128xf32>
    %26 = arith.addf %24, %25 : vector<8x128xf32>
    %cst_23 = arith.constant 0.000000e+00 : f32
    %27 = vector.broadcast %cst_23 : f32 to vector<8x128xf32>
    %28 = arith.maximumf %26, %27 : vector<8x128xf32>
    %29 = arith.truncf %28 : vector<8x128xf32> to vector<8x128xbf16>
    %cst_24 = arith.constant dense<0.000000e+00> : vector<8x512xf32>
    %30 = tpu.matmul %29, %9, %cst_24 {dimension_numbers = #tpu.dot_dimension_numbers<[1], [0], [0], [1], [0, 0, 1, 1], [], []>} : vector<8x128xbf16>, vector<128x512xbf16>, vector<8x512xf32> -> vector<8x512xf32>
    %31 = vector.broadcast %4 : vector<1x512xf32> to vector<8x512xf32>
    %32 = arith.addf %30, %31 : vector<8x512xf32>
    %cst_25 = arith.constant 0.000000e+00 : f32
    %33 = vector.broadcast %cst_25 : f32 to vector<1x128xf32>
    %cst_26 = arith.constant 0.000000e+00 : f32
    %34 = vector.broadcast %cst_26 : f32 to vector<1x128xf32>
    %cst_27 = arith.constant 0.000000e+00 : f32
    %35 = vector.broadcast %cst_27 : f32 to vector<8x128xf32>
    %36 = tpu.iota {dimensions = array<i32: 0>} : vector<8x128xi32>
    %37 = vector.extract_strided_slice %32 {offsets = [0, 0], sizes = [1, 512], strides = [1, 1]} : vector<8x512xf32> to vector<1x512xf32>
    %38 = arith.truncf %33 : vector<1x128xf32> to vector<1x128xbf16>
    %cst_28 = arith.constant dense<0.000000e+00> : vector<1x512xf32>
    %39 = tpu.matmul %38, %10, %cst_28 {dimension_numbers = #tpu.dot_dimension_numbers<[1], [0], [0], [1], [0, 0, 1, 1], [], []>} : vector<1x128xbf16>, vector<128x512xbf16>, vector<1x512xf32> -> vector<1x512xf32>
    %40 = arith.addf %37, %39 : vector<1x512xf32>
    %41 = vector.extract_strided_slice %40 {offsets = [0, 0], sizes = [1, 128], strides = [1, 1]} : vector<1x512xf32> to vector<1x128xf32>
    %42 = arith.negf %41 : vector<1x128xf32>
    %43 = math.exp %42 : vector<1x128xf32>
    %cst_29 = arith.constant 1.000000e+00 : f32
    %44 = vector.broadcast %cst_29 : f32 to vector<1x128xf32>
    %45 = arith.addf %44, %43 : vector<1x128xf32>
    %46 = arith.divf %44, %45 : vector<1x128xf32>
    %47 = vector.extract_strided_slice %40 {offsets = [0, 128], sizes = [1, 128], strides = [1, 1]} : vector<1x512xf32> to vector<1x128xf32>
    %48 = arith.negf %47 : vector<1x128xf32>
    %49 = math.exp %48 : vector<1x128xf32>
    %cst_30 = arith.constant 1.000000e+00 : f32
    %50 = vector.broadcast %cst_30 : f32 to vector<1x128xf32>
    %51 = arith.addf %50, %49 : vector<1x128xf32>
    %52 = arith.divf %50, %51 : vector<1x128xf32>
    %53 = vector.extract_strided_slice %40 {offsets = [0, 256], sizes = [1, 128], strides = [1, 1]} : vector<1x512xf32> to vector<1x128xf32>
    %54 = math.tanh %53 : vector<1x128xf32>
    %55 = vector.extract_strided_slice %40 {offsets = [0, 384], sizes = [1, 128], strides = [1, 1]} : vector<1x512xf32> to vector<1x128xf32>
    %56 = arith.negf %55 : vector<1x128xf32>
    %57 = math.exp %56 : vector<1x128xf32>
    %cst_31 = arith.constant 1.000000e+00 : f32
    %58 = vector.broadcast %cst_31 : f32 to vector<1x128xf32>
    %59 = arith.addf %58, %57 : vector<1x128xf32>
    %60 = arith.divf %58, %59 : vector<1x128xf32>
    %61 = arith.mulf %52, %34 : vector<1x128xf32>
    %62 = arith.mulf %46, %54 : vector<1x128xf32>
    %63 = arith.addf %61, %62 : vector<1x128xf32>
    %64 = math.tanh %63 : vector<1x128xf32>
    %65 = arith.mulf %60, %64 : vector<1x128xf32>
    %c0_i32 = arith.constant 0 : i32
    %66 = vector.broadcast %c0_i32 : i32 to vector<8x128xi32>
    %67 = arith.cmpi eq, %36, %66 : vector<8x128xi32>
    %68 = vector.shape_cast %65 : vector<1x128xf32> to vector<1x128xf32>
    %69 = vector.broadcast %68 : vector<1x128xf32> to vector<8x128xf32>
    %70 = arith.select %67, %69, %35 : vector<8x128xi1>, vector<8x128xf32>
    %71 = vector.extract_strided_slice %32 {offsets = [1, 0], sizes = [1, 512], strides = [1, 1]} : vector<8x512xf32> to vector<1x512xf32>
    %72 = arith.truncf %65 : vector<1x128xf32> to vector<1x128xbf16>
    %cst_32 = arith.constant dense<0.000000e+00> : vector<1x512xf32>
    %73 = tpu.matmul %72, %10, %cst_32 {dimension_numbers = #tpu.dot_dimension_numbers<[1], [0], [0], [1], [0, 0, 1, 1], [], []>} : vector<1x128xbf16>, vector<128x512xbf16>, vector<1x512xf32> -> vector<1x512xf32>
    %74 = arith.addf %71, %73 : vector<1x512xf32>
    %75 = vector.extract_strided_slice %74 {offsets = [0, 0], sizes = [1, 128], strides = [1, 1]} : vector<1x512xf32> to vector<1x128xf32>
    %76 = arith.negf %75 : vector<1x128xf32>
    %77 = math.exp %76 : vector<1x128xf32>
    %cst_33 = arith.constant 1.000000e+00 : f32
    %78 = vector.broadcast %cst_33 : f32 to vector<1x128xf32>
    %79 = arith.addf %78, %77 : vector<1x128xf32>
    %80 = arith.divf %78, %79 : vector<1x128xf32>
    %81 = vector.extract_strided_slice %74 {offsets = [0, 128], sizes = [1, 128], strides = [1, 1]} : vector<1x512xf32> to vector<1x128xf32>
    %82 = arith.negf %81 : vector<1x128xf32>
    %83 = math.exp %82 : vector<1x128xf32>
    %cst_34 = arith.constant 1.000000e+00 : f32
    %84 = vector.broadcast %cst_34 : f32 to vector<1x128xf32>
    %85 = arith.addf %84, %83 : vector<1x128xf32>
    %86 = arith.divf %84, %85 : vector<1x128xf32>
    %87 = vector.extract_strided_slice %74 {offsets = [0, 256], sizes = [1, 128], strides = [1, 1]} : vector<1x512xf32> to vector<1x128xf32>
    %88 = math.tanh %87 : vector<1x128xf32>
    %89 = vector.extract_strided_slice %74 {offsets = [0, 384], sizes = [1, 128], strides = [1, 1]} : vector<1x512xf32> to vector<1x128xf32>
    %90 = arith.negf %89 : vector<1x128xf32>
    %91 = math.exp %90 : vector<1x128xf32>
    %cst_35 = arith.constant 1.000000e+00 : f32
    %92 = vector.broadcast %cst_35 : f32 to vector<1x128xf32>
    %93 = arith.addf %92, %91 : vector<1x128xf32>
    %94 = arith.divf %92, %93 : vector<1x128xf32>
    %95 = arith.mulf %86, %63 : vector<1x128xf32>
    %96 = arith.mulf %80, %88 : vector<1x128xf32>
    %97 = arith.addf %95, %96 : vector<1x128xf32>
    %98 = math.tanh %97 : vector<1x128xf32>
    %99 = arith.mulf %94, %98 : vector<1x128xf32>
    %c1_i32 = arith.constant 1 : i32
    %100 = vector.broadcast %c1_i32 : i32 to vector<8x128xi32>
    %101 = arith.cmpi eq, %36, %100 : vector<8x128xi32>
    %102 = vector.shape_cast %99 : vector<1x128xf32> to vector<1x128xf32>
    %103 = vector.broadcast %102 : vector<1x128xf32> to vector<8x128xf32>
    %104 = arith.select %101, %103, %70 : vector<8x128xi1>, vector<8x128xf32>
    %105 = vector.extract_strided_slice %32 {offsets = [2, 0], sizes = [1, 512], strides = [1, 1]} : vector<8x512xf32> to vector<1x512xf32>
    %106 = arith.truncf %99 : vector<1x128xf32> to vector<1x128xbf16>
    %cst_36 = arith.constant dense<0.000000e+00> : vector<1x512xf32>
    %107 = tpu.matmul %106, %10, %cst_36 {dimension_numbers = #tpu.dot_dimension_numbers<[1], [0], [0], [1], [0, 0, 1, 1], [], []>} : vector<1x128xbf16>, vector<128x512xbf16>, vector<1x512xf32> -> vector<1x512xf32>
    %108 = arith.addf %105, %107 : vector<1x512xf32>
    %109 = vector.extract_strided_slice %108 {offsets = [0, 0], sizes = [1, 128], strides = [1, 1]} : vector<1x512xf32> to vector<1x128xf32>
    %110 = arith.negf %109 : vector<1x128xf32>
    %111 = math.exp %110 : vector<1x128xf32>
    %cst_37 = arith.constant 1.000000e+00 : f32
    %112 = vector.broadcast %cst_37 : f32 to vector<1x128xf32>
    %113 = arith.addf %112, %111 : vector<1x128xf32>
    %114 = arith.divf %112, %113 : vector<1x128xf32>
    %115 = vector.extract_strided_slice %108 {offsets = [0, 128], sizes = [1, 128], strides = [1, 1]} : vector<1x512xf32> to vector<1x128xf32>
    %116 = arith.negf %115 : vector<1x128xf32>
    %117 = math.exp %116 : vector<1x128xf32>
    %cst_38 = arith.constant 1.000000e+00 : f32
    %118 = vector.broadcast %cst_38 : f32 to vector<1x128xf32>
    %119 = arith.addf %118, %117 : vector<1x128xf32>
    %120 = arith.divf %118, %119 : vector<1x128xf32>
    %121 = vector.extract_strided_slice %108 {offsets = [0, 256], sizes = [1, 128], strides = [1, 1]} : vector<1x512xf32> to vector<1x128xf32>
    %122 = math.tanh %121 : vector<1x128xf32>
    %123 = vector.extract_strided_slice %108 {offsets = [0, 384], sizes = [1, 128], strides = [1, 1]} : vector<1x512xf32> to vector<1x128xf32>
    %124 = arith.negf %123 : vector<1x128xf32>
    %125 = math.exp %124 : vector<1x128xf32>
    %cst_39 = arith.constant 1.000000e+00 : f32
    %126 = vector.broadcast %cst_39 : f32 to vector<1x128xf32>
    %127 = arith.addf %126, %125 : vector<1x128xf32>
    %128 = arith.divf %126, %127 : vector<1x128xf32>
    %129 = arith.mulf %120, %97 : vector<1x128xf32>
    %130 = arith.mulf %114, %122 : vector<1x128xf32>
    %131 = arith.addf %129, %130 : vector<1x128xf32>
    %132 = math.tanh %131 : vector<1x128xf32>
    %133 = arith.mulf %128, %132 : vector<1x128xf32>
    %c2_i32 = arith.constant 2 : i32
    %134 = vector.broadcast %c2_i32 : i32 to vector<8x128xi32>
    %135 = arith.cmpi eq, %36, %134 : vector<8x128xi32>
    %136 = vector.shape_cast %133 : vector<1x128xf32> to vector<1x128xf32>
    %137 = vector.broadcast %136 : vector<1x128xf32> to vector<8x128xf32>
    %138 = arith.select %135, %137, %104 : vector<8x128xi1>, vector<8x128xf32>
    %139 = vector.extract_strided_slice %32 {offsets = [3, 0], sizes = [1, 512], strides = [1, 1]} : vector<8x512xf32> to vector<1x512xf32>
    %140 = arith.truncf %133 : vector<1x128xf32> to vector<1x128xbf16>
    %cst_40 = arith.constant dense<0.000000e+00> : vector<1x512xf32>
    %141 = tpu.matmul %140, %10, %cst_40 {dimension_numbers = #tpu.dot_dimension_numbers<[1], [0], [0], [1], [0, 0, 1, 1], [], []>} : vector<1x128xbf16>, vector<128x512xbf16>, vector<1x512xf32> -> vector<1x512xf32>
    %142 = arith.addf %139, %141 : vector<1x512xf32>
    %143 = vector.extract_strided_slice %142 {offsets = [0, 0], sizes = [1, 128], strides = [1, 1]} : vector<1x512xf32> to vector<1x128xf32>
    %144 = arith.negf %143 : vector<1x128xf32>
    %145 = math.exp %144 : vector<1x128xf32>
    %cst_41 = arith.constant 1.000000e+00 : f32
    %146 = vector.broadcast %cst_41 : f32 to vector<1x128xf32>
    %147 = arith.addf %146, %145 : vector<1x128xf32>
    %148 = arith.divf %146, %147 : vector<1x128xf32>
    %149 = vector.extract_strided_slice %142 {offsets = [0, 128], sizes = [1, 128], strides = [1, 1]} : vector<1x512xf32> to vector<1x128xf32>
    %150 = arith.negf %149 : vector<1x128xf32>
    %151 = math.exp %150 : vector<1x128xf32>
    %cst_42 = arith.constant 1.000000e+00 : f32
    %152 = vector.broadcast %cst_42 : f32 to vector<1x128xf32>
    %153 = arith.addf %152, %151 : vector<1x128xf32>
    %154 = arith.divf %152, %153 : vector<1x128xf32>
    %155 = vector.extract_strided_slice %142 {offsets = [0, 256], sizes = [1, 128], strides = [1, 1]} : vector<1x512xf32> to vector<1x128xf32>
    %156 = math.tanh %155 : vector<1x128xf32>
    %157 = vector.extract_strided_slice %142 {offsets = [0, 384], sizes = [1, 128], strides = [1, 1]} : vector<1x512xf32> to vector<1x128xf32>
    %158 = arith.negf %157 : vector<1x128xf32>
    %159 = math.exp %158 : vector<1x128xf32>
    %cst_43 = arith.constant 1.000000e+00 : f32
    %160 = vector.broadcast %cst_43 : f32 to vector<1x128xf32>
    %161 = arith.addf %160, %159 : vector<1x128xf32>
    %162 = arith.divf %160, %161 : vector<1x128xf32>
    %163 = arith.mulf %154, %131 : vector<1x128xf32>
    %164 = arith.mulf %148, %156 : vector<1x128xf32>
    %165 = arith.addf %163, %164 : vector<1x128xf32>
    %166 = math.tanh %165 : vector<1x128xf32>
    %167 = arith.mulf %162, %166 : vector<1x128xf32>
    %c3_i32 = arith.constant 3 : i32
    %168 = vector.broadcast %c3_i32 : i32 to vector<8x128xi32>
    %169 = arith.cmpi eq, %36, %168 : vector<8x128xi32>
    %170 = vector.shape_cast %167 : vector<1x128xf32> to vector<1x128xf32>
    %171 = vector.broadcast %170 : vector<1x128xf32> to vector<8x128xf32>
    %172 = arith.select %169, %171, %138 : vector<8x128xi1>, vector<8x128xf32>
    %173 = vector.extract_strided_slice %32 {offsets = [4, 0], sizes = [1, 512], strides = [1, 1]} : vector<8x512xf32> to vector<1x512xf32>
    %174 = arith.truncf %167 : vector<1x128xf32> to vector<1x128xbf16>
    %cst_44 = arith.constant dense<0.000000e+00> : vector<1x512xf32>
    %175 = tpu.matmul %174, %10, %cst_44 {dimension_numbers = #tpu.dot_dimension_numbers<[1], [0], [0], [1], [0, 0, 1, 1], [], []>} : vector<1x128xbf16>, vector<128x512xbf16>, vector<1x512xf32> -> vector<1x512xf32>
    %176 = arith.addf %173, %175 : vector<1x512xf32>
    %177 = vector.extract_strided_slice %176 {offsets = [0, 0], sizes = [1, 128], strides = [1, 1]} : vector<1x512xf32> to vector<1x128xf32>
    %178 = arith.negf %177 : vector<1x128xf32>
    %179 = math.exp %178 : vector<1x128xf32>
    %cst_45 = arith.constant 1.000000e+00 : f32
    %180 = vector.broadcast %cst_45 : f32 to vector<1x128xf32>
    %181 = arith.addf %180, %179 : vector<1x128xf32>
    %182 = arith.divf %180, %181 : vector<1x128xf32>
    %183 = vector.extract_strided_slice %176 {offsets = [0, 128], sizes = [1, 128], strides = [1, 1]} : vector<1x512xf32> to vector<1x128xf32>
    %184 = arith.negf %183 : vector<1x128xf32>
    %185 = math.exp %184 : vector<1x128xf32>
    %cst_46 = arith.constant 1.000000e+00 : f32
    %186 = vector.broadcast %cst_46 : f32 to vector<1x128xf32>
    %187 = arith.addf %186, %185 : vector<1x128xf32>
    %188 = arith.divf %186, %187 : vector<1x128xf32>
    %189 = vector.extract_strided_slice %176 {offsets = [0, 256], sizes = [1, 128], strides = [1, 1]} : vector<1x512xf32> to vector<1x128xf32>
    %190 = math.tanh %189 : vector<1x128xf32>
    %191 = vector.extract_strided_slice %176 {offsets = [0, 384], sizes = [1, 128], strides = [1, 1]} : vector<1x512xf32> to vector<1x128xf32>
    %192 = arith.negf %191 : vector<1x128xf32>
    %193 = math.exp %192 : vector<1x128xf32>
    %cst_47 = arith.constant 1.000000e+00 : f32
    %194 = vector.broadcast %cst_47 : f32 to vector<1x128xf32>
    %195 = arith.addf %194, %193 : vector<1x128xf32>
    %196 = arith.divf %194, %195 : vector<1x128xf32>
    %197 = arith.mulf %188, %165 : vector<1x128xf32>
    %198 = arith.mulf %182, %190 : vector<1x128xf32>
    %199 = arith.addf %197, %198 : vector<1x128xf32>
    %200 = math.tanh %199 : vector<1x128xf32>
    %201 = arith.mulf %196, %200 : vector<1x128xf32>
    %c4_i32 = arith.constant 4 : i32
    %202 = vector.broadcast %c4_i32 : i32 to vector<8x128xi32>
    %203 = arith.cmpi eq, %36, %202 : vector<8x128xi32>
    %204 = vector.shape_cast %201 : vector<1x128xf32> to vector<1x128xf32>
    %205 = vector.broadcast %204 : vector<1x128xf32> to vector<8x128xf32>
    %206 = arith.select %203, %205, %172 : vector<8x128xi1>, vector<8x128xf32>
    %207 = vector.extract_strided_slice %32 {offsets = [5, 0], sizes = [1, 512], strides = [1, 1]} : vector<8x512xf32> to vector<1x512xf32>
    %208 = arith.truncf %201 : vector<1x128xf32> to vector<1x128xbf16>
    %cst_48 = arith.constant dense<0.000000e+00> : vector<1x512xf32>
    %209 = tpu.matmul %208, %10, %cst_48 {dimension_numbers = #tpu.dot_dimension_numbers<[1], [0], [0], [1], [0, 0, 1, 1], [], []>} : vector<1x128xbf16>, vector<128x512xbf16>, vector<1x512xf32> -> vector<1x512xf32>
    %210 = arith.addf %207, %209 : vector<1x512xf32>
    %211 = vector.extract_strided_slice %210 {offsets = [0, 0], sizes = [1, 128], strides = [1, 1]} : vector<1x512xf32> to vector<1x128xf32>
    %212 = arith.negf %211 : vector<1x128xf32>
    %213 = math.exp %212 : vector<1x128xf32>
    %cst_49 = arith.constant 1.000000e+00 : f32
    %214 = vector.broadcast %cst_49 : f32 to vector<1x128xf32>
    %215 = arith.addf %214, %213 : vector<1x128xf32>
    %216 = arith.divf %214, %215 : vector<1x128xf32>
    %217 = vector.extract_strided_slice %210 {offsets = [0, 128], sizes = [1, 128], strides = [1, 1]} : vector<1x512xf32> to vector<1x128xf32>
    %218 = arith.negf %217 : vector<1x128xf32>
    %219 = math.exp %218 : vector<1x128xf32>
    %cst_50 = arith.constant 1.000000e+00 : f32
    %220 = vector.broadcast %cst_50 : f32 to vector<1x128xf32>
    %221 = arith.addf %220, %219 : vector<1x128xf32>
    %222 = arith.divf %220, %221 : vector<1x128xf32>
    %223 = vector.extract_strided_slice %210 {offsets = [0, 256], sizes = [1, 128], strides = [1, 1]} : vector<1x512xf32> to vector<1x128xf32>
    %224 = math.tanh %223 : vector<1x128xf32>
    %225 = vector.extract_strided_slice %210 {offsets = [0, 384], sizes = [1, 128], strides = [1, 1]} : vector<1x512xf32> to vector<1x128xf32>
    %226 = arith.negf %225 : vector<1x128xf32>
    %227 = math.exp %226 : vector<1x128xf32>
    %cst_51 = arith.constant 1.000000e+00 : f32
    %228 = vector.broadcast %cst_51 : f32 to vector<1x128xf32>
    %229 = arith.addf %228, %227 : vector<1x128xf32>
    %230 = arith.divf %228, %229 : vector<1x128xf32>
    %231 = arith.mulf %222, %199 : vector<1x128xf32>
    %232 = arith.mulf %216, %224 : vector<1x128xf32>
    %233 = arith.addf %231, %232 : vector<1x128xf32>
    %234 = math.tanh %233 : vector<1x128xf32>
    %235 = arith.mulf %230, %234 : vector<1x128xf32>
    %c5_i32 = arith.constant 5 : i32
    %236 = vector.broadcast %c5_i32 : i32 to vector<8x128xi32>
    %237 = arith.cmpi eq, %36, %236 : vector<8x128xi32>
    %238 = vector.shape_cast %235 : vector<1x128xf32> to vector<1x128xf32>
    %239 = vector.broadcast %238 : vector<1x128xf32> to vector<8x128xf32>
    %240 = arith.select %237, %239, %206 : vector<8x128xi1>, vector<8x128xf32>
    %241 = vector.extract_strided_slice %32 {offsets = [6, 0], sizes = [1, 512], strides = [1, 1]} : vector<8x512xf32> to vector<1x512xf32>
    %242 = arith.truncf %235 : vector<1x128xf32> to vector<1x128xbf16>
    %cst_52 = arith.constant dense<0.000000e+00> : vector<1x512xf32>
    %243 = tpu.matmul %242, %10, %cst_52 {dimension_numbers = #tpu.dot_dimension_numbers<[1], [0], [0], [1], [0, 0, 1, 1], [], []>} : vector<1x128xbf16>, vector<128x512xbf16>, vector<1x512xf32> -> vector<1x512xf32>
    %244 = arith.addf %241, %243 : vector<1x512xf32>
    %245 = vector.extract_strided_slice %244 {offsets = [0, 0], sizes = [1, 128], strides = [1, 1]} : vector<1x512xf32> to vector<1x128xf32>
    %246 = arith.negf %245 : vector<1x128xf32>
    %247 = math.exp %246 : vector<1x128xf32>
    %cst_53 = arith.constant 1.000000e+00 : f32
    %248 = vector.broadcast %cst_53 : f32 to vector<1x128xf32>
    %249 = arith.addf %248, %247 : vector<1x128xf32>
    %250 = arith.divf %248, %249 : vector<1x128xf32>
    %251 = vector.extract_strided_slice %244 {offsets = [0, 128], sizes = [1, 128], strides = [1, 1]} : vector<1x512xf32> to vector<1x128xf32>
    %252 = arith.negf %251 : vector<1x128xf32>
    %253 = math.exp %252 : vector<1x128xf32>
    %cst_54 = arith.constant 1.000000e+00 : f32
    %254 = vector.broadcast %cst_54 : f32 to vector<1x128xf32>
    %255 = arith.addf %254, %253 : vector<1x128xf32>
    %256 = arith.divf %254, %255 : vector<1x128xf32>
    %257 = vector.extract_strided_slice %244 {offsets = [0, 256], sizes = [1, 128], strides = [1, 1]} : vector<1x512xf32> to vector<1x128xf32>
    %258 = math.tanh %257 : vector<1x128xf32>
    %259 = vector.extract_strided_slice %244 {offsets = [0, 384], sizes = [1, 128], strides = [1, 1]} : vector<1x512xf32> to vector<1x128xf32>
    %260 = arith.negf %259 : vector<1x128xf32>
    %261 = math.exp %260 : vector<1x128xf32>
    %cst_55 = arith.constant 1.000000e+00 : f32
    %262 = vector.broadcast %cst_55 : f32 to vector<1x128xf32>
    %263 = arith.addf %262, %261 : vector<1x128xf32>
    %264 = arith.divf %262, %263 : vector<1x128xf32>
    %265 = arith.mulf %256, %233 : vector<1x128xf32>
    %266 = arith.mulf %250, %258 : vector<1x128xf32>
    %267 = arith.addf %265, %266 : vector<1x128xf32>
    %268 = math.tanh %267 : vector<1x128xf32>
    %269 = arith.mulf %264, %268 : vector<1x128xf32>
    %c6_i32 = arith.constant 6 : i32
    %270 = vector.broadcast %c6_i32 : i32 to vector<8x128xi32>
    %271 = arith.cmpi eq, %36, %270 : vector<8x128xi32>
    %272 = vector.shape_cast %269 : vector<1x128xf32> to vector<1x128xf32>
    %273 = vector.broadcast %272 : vector<1x128xf32> to vector<8x128xf32>
    %274 = arith.select %271, %273, %240 : vector<8x128xi1>, vector<8x128xf32>
    %275 = vector.extract_strided_slice %32 {offsets = [7, 0], sizes = [1, 512], strides = [1, 1]} : vector<8x512xf32> to vector<1x512xf32>
    %276 = arith.truncf %269 : vector<1x128xf32> to vector<1x128xbf16>
    %cst_56 = arith.constant dense<0.000000e+00> : vector<1x512xf32>
    %277 = tpu.matmul %276, %10, %cst_56 {dimension_numbers = #tpu.dot_dimension_numbers<[1], [0], [0], [1], [0, 0, 1, 1], [], []>} : vector<1x128xbf16>, vector<128x512xbf16>, vector<1x512xf32> -> vector<1x512xf32>
    %278 = arith.addf %275, %277 : vector<1x512xf32>
    %279 = vector.extract_strided_slice %278 {offsets = [0, 0], sizes = [1, 128], strides = [1, 1]} : vector<1x512xf32> to vector<1x128xf32>
    %280 = arith.negf %279 : vector<1x128xf32>
    %281 = math.exp %280 : vector<1x128xf32>
    %cst_57 = arith.constant 1.000000e+00 : f32
    %282 = vector.broadcast %cst_57 : f32 to vector<1x128xf32>
    %283 = arith.addf %282, %281 : vector<1x128xf32>
    %284 = arith.divf %282, %283 : vector<1x128xf32>
    %285 = vector.extract_strided_slice %278 {offsets = [0, 128], sizes = [1, 128], strides = [1, 1]} : vector<1x512xf32> to vector<1x128xf32>
    %286 = arith.negf %285 : vector<1x128xf32>
    %287 = math.exp %286 : vector<1x128xf32>
    %cst_58 = arith.constant 1.000000e+00 : f32
    %288 = vector.broadcast %cst_58 : f32 to vector<1x128xf32>
    %289 = arith.addf %288, %287 : vector<1x128xf32>
    %290 = arith.divf %288, %289 : vector<1x128xf32>
    %291 = vector.extract_strided_slice %278 {offsets = [0, 256], sizes = [1, 128], strides = [1, 1]} : vector<1x512xf32> to vector<1x128xf32>
    %292 = math.tanh %291 : vector<1x128xf32>
    %293 = vector.extract_strided_slice %278 {offsets = [0, 384], sizes = [1, 128], strides = [1, 1]} : vector<1x512xf32> to vector<1x128xf32>
    %294 = arith.negf %293 : vector<1x128xf32>
    %295 = math.exp %294 : vector<1x128xf32>
    %cst_59 = arith.constant 1.000000e+00 : f32
    %296 = vector.broadcast %cst_59 : f32 to vector<1x128xf32>
    %297 = arith.addf %296, %295 : vector<1x128xf32>
    %298 = arith.divf %296, %297 : vector<1x128xf32>
    %299 = arith.mulf %290, %267 : vector<1x128xf32>
    %300 = arith.mulf %284, %292 : vector<1x128xf32>
    %301 = arith.addf %299, %300 : vector<1x128xf32>
    %302 = math.tanh %301 : vector<1x128xf32>
    %303 = arith.mulf %298, %302 : vector<1x128xf32>
    %c7_i32 = arith.constant 7 : i32
    %304 = vector.broadcast %c7_i32 : i32 to vector<8x128xi32>
    %305 = arith.cmpi eq, %36, %304 : vector<8x128xi32>
    %306 = vector.shape_cast %303 : vector<1x128xf32> to vector<1x128xf32>
    %307 = vector.broadcast %306 : vector<1x128xf32> to vector<8x128xf32>
    %308 = arith.select %305, %307, %274 : vector<8x128xi1>, vector<8x128xf32>
    %309 = arith.truncf %308 : vector<8x128xf32> to vector<8x128xbf16>
    %cst_60 = arith.constant dense<0.000000e+00> : vector<8x128xf32>
    %310 = tpu.matmul %309, %8, %cst_60 {dimension_numbers = #tpu.dot_dimension_numbers<[1], [0], [0], [1], [0, 0, 1, 1], [], []>} : vector<8x128xbf16>, vector<128x128xbf16>, vector<8x128xf32> -> vector<8x128xf32>
    %311 = vector.broadcast %3 : vector<1x128xf32> to vector<8x128xf32>
    %312 = arith.addf %310, %311 : vector<8x128xf32>
    %313 = tpu.iota {dimensions = array<i32: 1>} : vector<8x128xi32>
    %c8_i32 = arith.constant 8 : i32
    %314 = vector.broadcast %c8_i32 : i32 to vector<8x128xi32>
    %315 = arith.cmpi slt, %313, %314 : vector<8x128xi32>
    %cst_61 = arith.constant -1.000000e+30 : f32
    %316 = vector.broadcast %cst_61 : f32 to vector<8x128xf32>
    %317 = arith.select %315, %312, %316 : vector<8x128xi1>, vector<8x128xf32>
    %cst_62 = arith.constant dense<0xFF800000> : vector<8xf32>
    %318 = vector.multi_reduction <maximumf>, %317, %cst_62 [1] : vector<8x128xf32> to vector<8xf32>
    %319 = vector.shape_cast %318 : vector<8xf32> to vector<8x1xf32>
    %320 = vector.broadcast %319 : vector<8x1xf32> to vector<8x128xf32>
    %321 = arith.subf %317, %320 : vector<8x128xf32>
    %322 = math.exp %321 : vector<8x128xf32>
    %cst_63 = arith.constant 0.000000e+00 : f32
    %323 = vector.broadcast %cst_63 : f32 to vector<8x128xf32>
    %324 = arith.select %315, %322, %323 : vector<8x128xi1>, vector<8x128xf32>
    %cst_64 = arith.constant dense<0.000000e+00> : vector<8xf32>
    %325 = vector.multi_reduction <add>, %324, %cst_64 [1] : vector<8x128xf32> to vector<8xf32>
    %326 = vector.shape_cast %325 : vector<8xf32> to vector<8x1xf32>
    %327 = tpu.reciprocal %326 {approx = true} : vector<8x1xf32> -> vector<8x1xf32>
    %328 = vector.broadcast %327 : vector<8x1xf32> to vector<8x128xf32>
    %329 = arith.mulf %324, %328 : vector<8x128xf32>
    %330 = arith.select %315, %329, %312 : vector<8x128xi1>, vector<8x128xf32>
    %c0_65 = arith.constant 0 : index
    %c0_66 = arith.constant 0 : index
    %331 = vector.load %arg4[%c0_65, %c0_66] : memref<8x128xf32, #tpu.memory_space<vmem>>, vector<8x128xf32>
    tpu.vector_store %arg4[%c0_65, %c0_66], %330 {strides = array<i32>} : memref<8x128xf32, #tpu.memory_space<vmem>>, vector<8x128xf32>,
    return
  }
}

</mosaic_0001>

<bundles_post_ra>
// kernel: _mctsnet_call.1
= control target key start
LH: loop header
LB: loop body
LE: loop exit
PB: predicated region body
PF: predicated region fallthrough
CT: control target
= control target key end

     0   :  { %9 = vsyncpa [#allocation3], 0  ;;  %s3197_s0 = inlined_call_operand.vmem [shape: bf16[8,128], index: 0, kind: input, shape index: {}]   ;;  %s3198_s1 = inlined_call_operand.hbm [shape: bf16[512,128], index: 1, kind: input, shape index: {}]   ;;  %s3199_s2 = inlined_call_operand.hbm [shape: bf16[256,512], index: 2, kind: input, shape index: {}]   ;;  %s3200_s3 = inlined_call_operand.vmem [shape: f32[1,1024], index: 3, kind: input, shape index: {}]   ;;  %s3201_s4 = inlined_call_operand.vmem [shape: f32[8,128], index: 4, kind: output, shape index: {}]  }
   0x1   :  { %10 = vsyncpa [#allocation5], 0  ;;  %s2658_s15 = smov [#allocation2]  }
   0x2   :  { %s18_s16 = sshll.u32 %s2658_s15, 4  ;;  %s19_s16 = int_to_ptr.vmem [resolvable:$true] %s18_s16 }
   0x3   :  { %s2622_s17 = scalar_lea.vmem %s19_s16, 4096  ;;  %p2627_p1 = scmp.lt.s32.totalorder %s19_s16, %s19_s16 }
   0x4   :  { %p2623_p0 = scmp.ne.s32.totalorder %s19_s16, %s2622_s17  ;;  %p2628_p2 = scmp.lt.s32.totalorder %s2622_s17, %s2622_s17 }
   0x6   :  { %p2629_p3 = por %p2628_p2, %p2627_p1 }
   0x8   :  { %p2630_p4 = pnand %p2629_p3, %p2623_p0 }
   0xa   :  { %2633 = shalt.err (!%p2630_p4)
}
   0xb   :  { %s2659_s18 = smov 64   ;;  %s2660_s19 = smov 4  }
   0xc   :  { %24 = dma.hbm_to_vmem [thread:$0]  %s3198_s1, 4096, %s19_s16, [#allocation3], %s2659_s18, %s2659_s18, %s2660_s19  }
   0xd   :  { %s2661_s22 = smov [#allocation4]  }
   0xe   :  { %s30_s23 = sshll.u32 %s2661_s22, 4  ;;  %s31_s23 = int_to_ptr.vmem [resolvable:$true] %s30_s23 }
   0xf   :  { %s2642_s24 = scalar_lea.vmem %s31_s23, 8192  ;;  %p2647_p6 = scmp.lt.s32.totalorder %s31_s23, %s31_s23 }
  0x10   :  { %p2643_p5 = scmp.ne.s32.totalorder %s31_s23, %s2642_s24  ;;  %p2648_p7 = scmp.lt.s32.totalorder %s2642_s24, %s2642_s24 }
  0x12   :  { %p2649_p8 = por %p2648_p7, %p2647_p6 }
  0x14   :  { %p2650_p9 = pnand %p2649_p8, %p2643_p5 }
  0x16   :  { %2653 = shalt.err (!%p2650_p9)
}
  0x17   :  { %s2662_s25 = smov 256   ;;  %s2663_s26 = smov 16  }
  0x18   :  { %36 = dma.hbm_to_vmem [thread:$0]  %s3199_s2, 8192, %s31_s23, [#allocation5], %s2662_s25, %s2662_s25, %s2663_s26  }
  0x19   :  { %2654 = dma.done.wait [#allocation3], 4096  }
  0x1a   :  { %2655 = vsyncadd [#allocation3], 4294963200 }
  0x1b   :  { %2656 = dma.done.wait [#allocation5], 8192  }
  0x1c   :  { %2657 = vsyncadd [#allocation5], 4294959104  ;;  %v2664_v0 = vmov 0.0   ;;  %vm2665_vm0 = vmmov 0   ;;  %v2322_v1 = vld [vmem:[#allocation2 + $0x38] sm:$0xff]   ;;  %v2323_v2 = vld [vmem:[#allocation2 + $0x30] sm:$0xff]  }
  0x1d   :  { %2233 = vmatprep.subr.bf16.mxu0 %v2664_v0  ;;  %2249 = vmatprep.mubr.msk.bf16.mxu0 %vm2665_vm0, %v2664_v0  ;;  %v2324_v3 = vld [vmem:[#allocation2 + $0x28] sm:$0xff]   ;;  %v2330_v4 = vld [vmem:[#allocation2 + $0x78] sm:$0xff]   ;;  %v2325_v5 = vld [vmem:[#allocation2 + $0x20] sm:$0xff]  }
  0x1e   :  { %2253 = vmatprep.subr.bf16.mxu1 %v2664_v0  ;;  %2269 = vmatprep.mubr.msk.bf16.mxu1 %vm2665_vm0, %v2664_v0  ;;  %v2331_v6 = vld [vmem:[#allocation2 + $0x70] sm:$0xff]   ;;  %v2326_v7 = vld [vmem:[#allocation2 + $0x18] sm:$0xff]   ;;  %v2332_v8 = vld [vmem:[#allocation2 + $0x68] sm:$0xff]  }
  0x1f   :  { %2234 = vmatpush3.bf16.msra.mxu0 %v2322_v1  ;;  %2254 = vmatpush3.bf16.msra.mxu1 %v2330_v4  ;;  %v2327_v9 = vld [vmem:[#allocation2 + $0x10] sm:$0xff]   ;;  %v2333_v10 = vld [vmem:[#allocation2 + $0x60] sm:$0xff]   ;;  %v2328_v11 = vld [vmem:[#allocation2 + $0x8] sm:$0xff]  }
  0x20   :  { %2235 = vmatprep.subr.bf16.mxu0 %v2664_v0  ;;  %2255 = vmatprep.subr.bf16.mxu1 %v2664_v0  ;;  %v2334_v12 = vld [vmem:[#allocation2 + $0x58] sm:$0xff]   ;;  %v2329_v13 = vld [vmem:[#allocation2] sm:$0xff]   ;;  %v2335_v14 = vld [vmem:[#allocation2 + $0x50] sm:$0xff]  }
  0x21   :  { %v179_v15 = vld [vmem:[%s3197_s0] sm:$0xf]  ;;  %v2336_v16 = vld [vmem:[#allocation2 + $0x48] sm:$0xff]   ;;  %v2338_v18 = vld [vmem:[#allocation2 + $0xb8] sm:$0xff]  }
  0x22   :  { %v2337_v17 = vld [vmem:[#allocation2 + $0x40] sm:$0xff]   ;;  %v2339_v19 = vld [vmem:[#allocation2 + $0xb0] sm:$0xff]   ;;  %v2340_v20 = vld [vmem:[#allocation2 + $0xa8] sm:$0xff]  }
  0x23   :  { %2236 = vmatpush3.bf16.msra.mxu0 %v2323_v2  ;;  %2256 = vmatpush3.bf16.msra.mxu1 %v2331_v6  ;;  %v2341_v21 = vld [vmem:[#allocation2 + $0xa0] sm:$0xff]   ;;  %v2342_v22 = vld [vmem:[#allocation2 + $0x98] sm:$0xff]   ;;  %v2343_v23 = vld [vmem:[#allocation2 + $0x90] sm:$0xff]  }
  0x24   :  { %2237 = vmatprep.subr.bf16.mxu0 %v2664_v0  ;;  %2257 = vmatprep.subr.bf16.mxu1 %v2664_v0  ;;  %v2073_v24 = vld [vmem:[%s3200_s3] ss:$0 sm:$0xff]  ;;  %v2344_v32 = vld [vmem:[#allocation2 + $0x88] sm:$0xff]   ;;  %v2348_v35 = vld [vmem:[#allocation4 + $0xe4] ss:$16 sps:$4 sm:$0xff]  }
  0x25   :  { %v2345_v33 = vld [vmem:[#allocation2 + $0x80] sm:$0xff]   ;;  %v2351_v36 = vld [vmem:[#allocation4 + $0xec] ss:$16 sps:$4 sm:$0xff]   ;;  %v2349_v55 = vld [vmem:[#allocation4 + $0xe8] ss:$16 sps:$4 sm:$0xff]  }
  0x26   :  { %v2346_v34 = vld [vmem:[#allocation4 + $0xe0] ss:$16 sps:$4 sm:$0xff]   ;;  %v2354_v37 = vld [vmem:[#allocation4 + $0xc4] ss:$16 sps:$4 sm:$0xff]   ;;  %v2357_v57 = vld [vmem:[#allocation4 + $0xcc] ss:$16 sps:$4 sm:$0xff]  }
  0x27   :  { %2238 = vmatpush3.bf16.msra.mxu0 %v2324_v3  ;;  %2258 = vmatpush3.bf16.msra.mxu1 %v2332_v8  ;;  %v2352_v38 = vld [vmem:[#allocation4 + $0xc0] ss:$16 sps:$4 sm:$0xff]   ;;  %v2360_v39 = vld [vmem:[#allocation4 + $0xa4] ss:$16 sps:$4 sm:$0xff]   ;;  %v2355_v59 = vld [vmem:[#allocation4 + $0xc8] ss:$16 sps:$4 sm:$0xff]  }
  0x28   :  { %2239 = vmatprep.subr.bf16.mxu0 %v2664_v0  ;;  %2259 = vmatprep.subr.bf16.mxu1 %v2664_v0  ;;  %v2358_v40 = vld [vmem:[#allocation4 + $0xa0] ss:$16 sps:$4 sm:$0xff]   ;;  %v2366_v41 = vld [vmem:[#allocation4 + $0x84] ss:$16 sps:$4 sm:$0xff]   ;;  %v2363_v60 = vld [vmem:[#allocation4 + $0xac] ss:$16 sps:$4 sm:$0xff]  }
  0x29   :  { %v2364_v42 = vld [vmem:[#allocation4 + $0x80] ss:$16 sps:$4 sm:$0xff]   ;;  %v2372_v43 = vld [vmem:[#allocation4 + $0x64] ss:$16 sps:$4 sm:$0xff]   ;;  %v2361_v61 = vld [vmem:[#allocation4 + $0xa8] ss:$16 sps:$4 sm:$0xff]  }
  0x2a   :  { %v2370_v44 = vld [vmem:[#allocation4 + $0x60] ss:$16 sps:$4 sm:$0xff]   ;;  %v2378_v45 = vld [vmem:[#allocation4 + $0x44] ss:$16 sps:$4 sm:$0xff]   ;;  %v2369_v62 = vld [vmem:[#allocation4 + $0x8c] ss:$16 sps:$4 sm:$0xff]  }
  0x2b   :  { %2240 = vmatpush3.bf16.msra.mxu0 %v2325_v5  ;;  %2260 = vmatpush3.bf16.msra.mxu1 %v2333_v10  ;;  %v2376_v46 = vld [vmem:[#allocation4 + $0x40] ss:$16 sps:$4 sm:$0xff]   ;;  %v2384_v47 = vld [vmem:[#allocation4 + $0x24] ss:$16 sps:$4 sm:$0xff]   ;;  %v2367_v63 = vld [vmem:[#allocation4 + $0x88] ss:$16 sps:$4 sm:$0xff]  }
  0x2c   :  { %2241 = vmatprep.subr.bf16.mxu0 %v2664_v0  ;;  %2261 = vmatprep.subr.bf16.mxu1 %v2664_v0  ;;  %v2382_v48 = vld [vmem:[#allocation4 + $0x20] ss:$16 sps:$4 sm:$0xff]   ;;  %v2375_v1 = vld [vmem:[#allocation4 + $0x6c] ss:$16 sps:$4 sm:$0xff]   ;;  %v2373_v2 = vld [vmem:[#allocation4 + $0x68] ss:$16 sps:$4 sm:$0xff]  }
  0x2d   :  { %v2082_v49 = vld [vmem:[%s3200_s3 + $0x1] ss:$0 sm:$0xff]  ;;  %v2381_v3 = vld [vmem:[#allocation4 + $0x4c] ss:$16 sps:$4 sm:$0xff]   ;;  %v2379_v4 = vld [vmem:[#allocation4 + $0x48] ss:$16 sps:$4 sm:$0xff]  }
  0x2e   :  { %v2387_v5 = vld [vmem:[#allocation4 + $0x2c] ss:$16 sps:$4 sm:$0xff]   ;;  %v2385_v6 = vld [vmem:[#allocation4 + $0x28] ss:$16 sps:$4 sm:$0xff]  }
  0x2f   :  { %2242 = vmatpush3.bf16.msra.mxu0 %v2326_v7  ;;  %2262 = vmatpush3.bf16.msra.mxu1 %v2334_v12  ;;  %v2390_v7 = vld [vmem:[#allocation4 + $0x4] ss:$16 sps:$4 sm:$0xff]   ;;  %v2393_v8 = vld [vmem:[#allocation4 + $0xc] ss:$16 sps:$4 sm:$0xff]   ;;  %v2391_v10 = vld [vmem:[#allocation4 + $0x8] ss:$16 sps:$4 sm:$0xff]  }
  0x30   :  { %2243 = vmatprep.subr.bf16.mxu0 %v2664_v0  ;;  %2263 = vmatprep.subr.bf16.mxu1 %v2664_v0  ;;  %v2739_v12 = vld [vmem:[#allocation4 + $0x1ec] ss:$16 sps:$4 sm:$0xff]  }
  0x33   :  { %2244 = vmatpush3.bf16.msra.mxu0 %v2327_v9  ;;  %2264 = vmatpush3.bf16.msra.mxu1 %v2335_v14  ;;  %v2388_v9 = vld [vmem:[#allocation4] ss:$16 sps:$4 sm:$0xff]  }
  0x34   :  { %2245 = vmatprep.subr.bf16.mxu0 %v2664_v0  ;;  %2265 = vmatprep.subr.bf16.mxu1 %v2664_v0  ;;  %v2091_v14 = vld [vmem:[%s3200_s3 + $0x2] ss:$0 sm:$0xff] }
  0x37   :  { %2246 = vmatpush3.bf16.msra.mxu0 %v2328_v11  ;;  %2266 = vmatpush3.bf16.msra.mxu1 %v2336_v16  ;;  %v2737_v11 = vld [vmem:[#allocation4 + $0x1e4] ss:$16 sps:$4 sm:$0xff]  }
  0x38   :  { %2247 = vmatprep.subr.bf16.mxu0 %v2664_v0  ;;  %2267 = vmatprep.subr.bf16.mxu1 %v2664_v0 }
  0x3b   :  { %2248 = vmatpush3.bf16.msra.mxu0 %v2329_v13  ;;  %2268 = vmatpush3.bf16.msra.mxu1 %v2337_v17  ;;  %v2666_v13 = vmov 0  }
  0x3c   :  { %2273 = vmatprep.subr.bf16.mxu0 %v2664_v0  ;;  %649 = vmatprep.subr.bf16.mxu1 %v2348_v35  ;;  %v2786_v35 = vld [vmem:[#allocation4 + $0x188] ss:$16 sps:$4 sm:$0xff]  }
  0x3e   :  { %2250 = vmatmul.mubr.bf16.vlgmr.msra.gmra.mxu0 %v179_v15 }
  0x3f   :  { %2289 = vmatprep.mubr.msk.bf16.mxu0 %vm2665_vm0, %v2664_v0  ;;  %2274 = vmatpush3.bf16.msra.mxu0 %v2338_v18 }
  0x40   :  { %2275 = vmatprep.subr.bf16.mxu0 %v2664_v0 }
  0x43   :  { %2276 = vmatpush3.bf16.msra.mxu0 %v2339_v19 }
  0x44   :  { %2277 = vmatprep.subr.bf16.mxu0 %v2664_v0 }
  0x47   :  { %2278 = vmatpush3.bf16.msra.mxu0 %v2340_v20  ;;  %v2748_v20 = vld [vmem:[#allocation4 + $0x1e0] ss:$16 sps:$4 sm:$0xff]  }
  0x48   :  { %2279 = vmatprep.subr.bf16.mxu0 %v2664_v0 }
  0x4b   :  { %2280 = vmatpush3.bf16.msra.mxu0 %v2341_v21  ;;  %v2750_v21 = vld [vmem:[#allocation4 + $0x1e8] ss:$16 sps:$4 sm:$0xff]  }
  0x4c   :  { %2281 = vmatprep.subr.bf16.mxu0 %v2664_v0 }
  0x4f   :  { %2282 = vmatpush3.bf16.msra.mxu0 %v2342_v22 }
  0x50   :  { %2283 = vmatprep.subr.bf16.mxu0 %v2664_v0 }
  0x53   :  { %2284 = vmatpush3.bf16.msra.mxu0 %v2343_v23  ;;  %v2752_v23 = vld [vmem:[#allocation4 + $0x1c4] ss:$16 sps:$4 sm:$0xff]  }
  0x54   :  { %2285 = vmatprep.subr.bf16.mxu0 %v2664_v0 }
  0x57   :  { %2286 = vmatpush3.bf16.msra.mxu0 %v2344_v32  ;;  %v2778_v32 = vld [vmem:[#allocation4 + $0x184] ss:$16 sps:$4 sm:$0xff]  }
  0x58   :  { %2287 = vmatprep.subr.bf16.mxu0 %v2664_v0 }
  0x5b   :  { %2288 = vmatpush3.bf16.msra.mxu0 %v2345_v33  ;;  %v2780_v33 = vld [vmem:[#allocation4 + $0x18c] ss:$16 sps:$4 sm:$0xff]  }
  0x5c   :  { %690 = vmatprep.subr.bf16.mxu0 %v2351_v36  ;;  %v2790_v36 = vld [vmem:[#allocation4 + $0x164] ss:$16 sps:$4 sm:$0xff]  }
  0xfe   :  { %v268_v25 = vpop.f32.mrf.mxu0 }
  0xff   :  { %v269_v26 = vadd.f32 %v2073_v24, %v268_v25  ;;  %v2754_v24 = vld [vmem:[#allocation4 + $0x1cc] ss:$16 sps:$4 sm:$0xff]  }
 0x100   :  { %v2251_v27 = vpop.f32.mrf.mxu0 }
 0x101   :  { %v274_v28 = vmax.f32 %v269_v26, 0.0  ;;  %v2758_v26 = vld [vmem:[#allocation4 + $0x1c0] ss:$16 sps:$4 sm:$0xff]   ;;  %v2760_v27 = vld [vmem:[#allocation4 + $0x1c8] ss:$16 sps:$4 sm:$0xff]  }
 0x102   :  { %v271_v29 = vpop.f32.mrf.mxu0 }
 0x103   :  { %v275_v30 = vpack.c.bf16 %v274_v28, %v274_v28  ;;  %v2764_v28 = vld [vmem:[#allocation4 + $0x1a4] ss:$16 sps:$4 sm:$0xff]   ;;  %v2766_v29 = vld [vmem:[#allocation4 + $0x1ac] ss:$16 sps:$4 sm:$0xff]  }
 0x104   :  { %v2252_v31 = vpop.f32.mrf.mxu0 }
 0x105   :  { %2270 = vmatmul.mubr.bf16.vlgmr.msra.gmra.mxu1 %v275_v30  ;;  %v2772_v30 = vld [vmem:[#allocation4 + $0x1a0] ss:$16 sps:$4 sm:$0xff]   ;;  %v2774_v31 = vld [vmem:[#allocation4 + $0x1a8] ss:$16 sps:$4 sm:$0xff]  }
 0x106   :  { %650 = vmatpush1.bf16.msra.mxu1 %v2346_v34  ;;  %681 = vmatprep.mubr.bf16.mxu1 %v2666_v13  ;;  %v2784_v34 = vld [vmem:[#allocation4 + $0x180] ss:$16 sps:$4 sm:$0xff]  }
 0x107   :  { %651 = vmatprep.subr.bf16.mxu1 %v2354_v37  ;;  %v2792_v37 = vld [vmem:[#allocation4 + $0x16c] ss:$16 sps:$4 sm:$0xff]  }
 0x10a   :  { %652 = vmatpush1.bf16.msra.mxu1 %v2352_v38  ;;  %v2796_v38 = vld [vmem:[#allocation4 + $0x160] ss:$16 sps:$4 sm:$0xff]  }
 0x10b   :  { %653 = vmatprep.subr.bf16.mxu1 %v2360_v39  ;;  %v2798_v39 = vld [vmem:[#allocation4 + $0x168] ss:$16 sps:$4 sm:$0xff]  }
 0x10e   :  { %654 = vmatpush1.bf16.msra.mxu1 %v2358_v40  ;;  %v2802_v40 = vld [vmem:[#allocation4 + $0x144] ss:$16 sps:$4 sm:$0xff]  }
 0x10f   :  { %655 = vmatprep.subr.bf16.mxu1 %v2366_v41  ;;  %v2804_v41 = vld [vmem:[#allocation4 + $0x14c] ss:$16 sps:$4 sm:$0xff]  }
 0x112   :  { %656 = vmatpush1.bf16.msra.mxu1 %v2364_v42  ;;  %v2808_v42 = vld [vmem:[#allocation4 + $0x140] ss:$16 sps:$4 sm:$0xff]  }
 0x113   :  { %657 = vmatprep.subr.bf16.mxu1 %v2372_v43  ;;  %v2810_v43 = vld [vmem:[#allocation4 + $0x148] ss:$16 sps:$4 sm:$0xff]  }
 0x116   :  { %658 = vmatpush1.bf16.msra.mxu1 %v2370_v44  ;;  %v2814_v44 = vld [vmem:[#allocation4 + $0x124] ss:$16 sps:$4 sm:$0xff]  }
 0x117   :  { %659 = vmatprep.subr.bf16.mxu1 %v2378_v45  ;;  %v2816_v45 = vld [vmem:[#allocation4 + $0x12c] ss:$16 sps:$4 sm:$0xff]  }
 0x11a   :  { %660 = vmatpush1.bf16.msra.mxu1 %v2376_v46  ;;  %v2820_v46 = vld [vmem:[#allocation4 + $0x120] ss:$16 sps:$4 sm:$0xff]  }
 0x11b   :  { %661 = vmatprep.subr.bf16.mxu1 %v2384_v47  ;;  %v2822_v47 = vld [vmem:[#allocation4 + $0x128] ss:$16 sps:$4 sm:$0xff]  }
 0x11e   :  { %662 = vmatpush1.bf16.msra.mxu1 %v2382_v48  ;;  %v2826_v48 = vld [vmem:[#allocation4 + $0x104] ss:$16 sps:$4 sm:$0xff]  }
 0x11f   :  { %663 = vmatprep.subr.bf16.mxu1 %v2390_v7 }
 0x122   :  { %664 = vmatpush1.bf16.msra.mxu1 %v2388_v9 }
 0x123   :  { %893 = vmatprep.subr.bf16.mxu1 %v2737_v11 }
 0x1c5   :  { %v364_v50 = vpop.f32.mrf.mxu1 }
 0x1c6   :  { %v365_v51 = vadd.f32 %v2082_v49, %v364_v50  ;;  %v2828_v49 = vld [vmem:[#allocation4 + $0x10c] ss:$16 sps:$4 sm:$0xff]   ;;  %v2832_v50 = vld [vmem:[#allocation4 + $0x100] ss:$16 sps:$4 sm:$0xff]  }
 0x1c7   :  { %v2271_v52 = vpop.f32.mrf.mxu1 }
 0x1c8   :  { %v370_v53 = vmax.f32 %v365_v51, 0.0  ;;  %v2834_v51 = vld [vmem:[#allocation4 + $0x108] ss:$16 sps:$4 sm:$0xff]  }
 0x1c9   :  { %v367_v54 = vpop.f32.mrf.mxu1 }
 0x1ca   :  { %v371_v56 = vpack.c.bf16 %v370_v53, %v370_v53 }
 0x1cb   :  { %v2272_v58 = vpop.f32.mrf.mxu1 }
 0x1cc   :  { %2290 = vmatmul.mubr.bf16.vlgmr.msra.gmra.mxu0 %v371_v56 }
 0x1cd   :  { %691 = vmatpush1.bf16.msra.mxu0 %v2349_v55  ;;  %722 = vmatprep.mubr.bf16.mxu0 %v2666_v13 }
 0x1ce   :  { %692 = vmatprep.subr.bf16.mxu0 %v2357_v57 }
 0x1d1   :  { %693 = vmatpush1.bf16.msra.mxu0 %v2355_v59 }
 0x1d2   :  { %694 = vmatprep.subr.bf16.mxu0 %v2363_v60  ;;  %v3202_v60 = vlaneseq }
 0x1d5   :  { %695 = vmatpush1.bf16.msra.mxu0 %v2361_v61  ;;  %v2879_v61 = vshrl.u32 %v3202_v60, 7 }
 0x1d6   :  { %696 = vmatprep.subr.bf16.mxu0 %v2369_v62 }
 0x1d7   :  { %v471_v62 = vsub.s32 0, %v2879_v61  ;;  %v483_v9 = vsub.s32 3, %v2879_v61  ;;  %vm1003_vm1 = vcmp.eq.s32.totalorder %v2879_v61, 0  ;;  %vm1135_vm2 = vcmp.eq.s32.totalorder %v2879_v61, 1 }
 0x1d8   :  { %vm1271_vm3 = vcmp.eq.s32.totalorder %v2879_v61, 2  ;;  %vm1406_vm4 = vcmp.eq.s32.totalorder %v2879_v61, 3  ;;  %vm1543_vm5 = vcmp.eq.s32.totalorder %v2879_v61, 4  ;;  %vm1678_vm6 = vcmp.eq.s32.totalorder %v2879_v61, 5 }
 0x1d9   :  { %697 = vmatpush1.bf16.msra.mxu0 %v2367_v63  ;;  %v50_v63 = vld [vmem:[%s3200_s3 + $0x4] sm:$0xf]  ;;  %vm1815_vm7 = vcmp.eq.s32.totalorder %v2879_v61, 6  ;;  %vm1950_vm8 = vcmp.eq.s32.totalorder %v2879_v61, 7 }
 0x1da   :  { %698 = vmatprep.subr.bf16.mxu0 %v2375_v1  ;;  %v475_v1 = vsub.s32 1, %v2879_v61 }
 0x1dd   :  { %699 = vmatpush1.bf16.msra.mxu0 %v2373_v2  ;;  %v472_v2 = vrot.slane %v50_v63, %v471_v62 }
 0x1de   :  { %700 = vmatprep.subr.bf16.mxu0 %v2381_v3  ;;  %v476_v3 = vrot.slane %v50_v63, %v475_v1 }
 0x1e1   :  { %701 = vmatpush1.bf16.msra.mxu0 %v2379_v4 }
 0x1e2   :  { %702 = vmatprep.subr.bf16.mxu0 %v2387_v5 }
 0x1e5   :  { %703 = vmatpush1.bf16.msra.mxu0 %v2385_v6 }
 0x1e6   :  { %704 = vmatprep.subr.bf16.mxu0 %v2393_v8 }
 0x1e9   :  { %705 = vmatpush1.bf16.msra.mxu0 %v2391_v10 }
 0x1ea   :  { %934 = vmatprep.subr.bf16.mxu0 %v2739_v12 }
 0x28c   :  { %v460_v15 = vpop.f32.mrf.mxu0 }
 0x28d   :  { %v461_v16 = vadd.f32 %v2091_v14, %v460_v15 }
 0x28e   :  { %v2291_v17 = vpop.f32.mrf.mxu0 }
 0x28f   :  { %v466_v18 = vmax.f32 %v461_v16, 0.0 }
 0x290   :  { %v463_v19 = vpop.f32.mrf.mxu0 }
 0x291   :  { %v467_v22 = vpack.c.bf16 %v466_v18, %v466_v18 }
 0x292   :  { %v2292_v25 = vpop.f32.mrf.mxu0 }
 0x293   :  { %682 = vmatmul.mubr.bf16.vlgmr.msra.gmra.mxu1 %v467_v22  ;;  %723 = vmatmul.mubr.bf16.vlgmr.msra.gmra.mxu0 %v467_v22  ;;  %v484_v22 = vrot.slane %v50_v63, %v483_v9 }
 0x294   :  { %894 = vmatpush1.bf16.msra.mxu1 %v2748_v20  ;;  %935 = vmatpush1.bf16.msra.mxu0 %v2750_v21 }
 0x295   :  { %895 = vmatprep.subr.bf16.mxu1 %v2752_v23  ;;  %936 = vmatprep.subr.bf16.mxu0 %v2754_v24 }
 0x296   :  { %925 = vmatprep.mubr.bf16.mxu1 %v2666_v13  ;;  %966 = vmatprep.mubr.bf16.mxu0 %v2666_v13 }
 0x298   :  { %896 = vmatpush1.bf16.msra.mxu1 %v2758_v26  ;;  %937 = vmatpush1.bf16.msra.mxu0 %v2760_v27 }
 0x299   :  { %897 = vmatprep.subr.bf16.mxu1 %v2764_v28  ;;  %938 = vmatprep.subr.bf16.mxu0 %v2766_v29 }
 0x29c   :  { %898 = vmatpush1.bf16.msra.mxu1 %v2772_v30  ;;  %939 = vmatpush1.bf16.msra.mxu0 %v2774_v31 }
 0x29d   :  { %899 = vmatprep.subr.bf16.mxu1 %v2778_v32  ;;  %940 = vmatprep.subr.bf16.mxu0 %v2780_v33 }
 0x2a0   :  { %900 = vmatpush1.bf16.msra.mxu1 %v2784_v34  ;;  %941 = vmatpush1.bf16.msra.mxu0 %v2786_v35 }
 0x2a1   :  { %901 = vmatprep.subr.bf16.mxu1 %v2790_v36  ;;  %942 = vmatprep.subr.bf16.mxu0 %v2792_v37 }
 0x2a4   :  { %902 = vmatpush1.bf16.msra.mxu1 %v2796_v38  ;;  %943 = vmatpush1.bf16.msra.mxu0 %v2798_v39 }
 0x2a5   :  { %903 = vmatprep.subr.bf16.mxu1 %v2802_v40  ;;  %944 = vmatprep.subr.bf16.mxu0 %v2804_v41 }
 0x2a8   :  { %904 = vmatpush1.bf16.msra.mxu1 %v2808_v42  ;;  %945 = vmatpush1.bf16.msra.mxu0 %v2810_v43 }
 0x2a9   :  { %905 = vmatprep.subr.bf16.mxu1 %v2814_v44  ;;  %946 = vmatprep.subr.bf16.mxu0 %v2816_v45 }
 0x2ac   :  { %906 = vmatpush1.bf16.msra.mxu1 %v2820_v46  ;;  %947 = vmatpush1.bf16.msra.mxu0 %v2822_v47 }
 0x2ad   :  { %907 = vmatprep.subr.bf16.mxu1 %v2826_v48  ;;  %948 = vmatprep.subr.bf16.mxu0 %v2828_v49 }
 0x2b0   :  { %908 = vmatpush1.bf16.msra.mxu1 %v2832_v50  ;;  %949 = vmatpush1.bf16.msra.mxu0 %v2834_v51 }
 0x2b1   :  { %1010 = vmatprep.subr.bf16.mxu1 %v2737_v11  ;;  %1051 = vmatprep.subr.bf16.mxu0 %v2739_v12 }
 0x2b3   :  { %926 = vmatmul.mubr.bf16.vlgmr.msra.gmra.mxu1 %v2666_v13  ;;  %967 = vmatmul.mubr.bf16.vlgmr.msra.gmra.mxu0 %v2666_v13 }
 0x2b4   :  { %1011 = vmatpush1.bf16.msra.mxu1 %v2748_v20  ;;  %1052 = vmatpush1.bf16.msra.mxu0 %v2750_v21 }
 0x2b5   :  { %1012 = vmatprep.subr.bf16.mxu1 %v2752_v23  ;;  %1053 = vmatprep.subr.bf16.mxu0 %v2754_v24 }
 0x2b6   :  { %1042 = vmatprep.mubr.bf16.mxu1 %v2666_v13  ;;  %1083 = vmatprep.mubr.bf16.mxu0 %v2666_v13 }
 0x2b8   :  { %1013 = vmatpush1.bf16.msra.mxu1 %v2758_v26  ;;  %1054 = vmatpush1.bf16.msra.mxu0 %v2760_v27 }
 0x2b9   :  { %1014 = vmatprep.subr.bf16.mxu1 %v2764_v28  ;;  %1055 = vmatprep.subr.bf16.mxu0 %v2766_v29 }
 0x2bc   :  { %1015 = vmatpush1.bf16.msra.mxu1 %v2772_v30  ;;  %1056 = vmatpush1.bf16.msra.mxu0 %v2774_v31 }
 0x2bd   :  { %1016 = vmatprep.subr.bf16.mxu1 %v2778_v32  ;;  %1057 = vmatprep.subr.bf16.mxu0 %v2780_v33 }
 0x2c0   :  { %1017 = vmatpush1.bf16.msra.mxu1 %v2784_v34  ;;  %1058 = vmatpush1.bf16.msra.mxu0 %v2786_v35 }
 0x2c1   :  { %1018 = vmatprep.subr.bf16.mxu1 %v2790_v36  ;;  %1059 = vmatprep.subr.bf16.mxu0 %v2792_v37 }
 0x2c4   :  { %1019 = vmatpush1.bf16.msra.mxu1 %v2796_v38  ;;  %1060 = vmatpush1.bf16.msra.mxu0 %v2798_v39 }
 0x2c5   :  { %1020 = vmatprep.subr.bf16.mxu1 %v2802_v40  ;;  %1061 = vmatprep.subr.bf16.mxu0 %v2804_v41 }
 0x2c8   :  { %1021 = vmatpush1.bf16.msra.mxu1 %v2808_v42  ;;  %1062 = vmatpush1.bf16.msra.mxu0 %v2810_v43 }
 0x2c9   :  { %1022 = vmatprep.subr.bf16.mxu1 %v2814_v44  ;;  %1063 = vmatprep.subr.bf16.mxu0 %v2816_v45 }
 0x2cc   :  { %1023 = vmatpush1.bf16.msra.mxu1 %v2820_v46  ;;  %1064 = vmatpush1.bf16.msra.mxu0 %v2822_v47 }
 0x2cd   :  { %1024 = vmatprep.subr.bf16.mxu1 %v2826_v48  ;;  %1065 = vmatprep.subr.bf16.mxu0 %v2828_v49 }
 0x2d0   :  { %1025 = vmatpush1.bf16.msra.mxu1 %v2832_v50  ;;  %1066 = vmatpush1.bf16.msra.mxu0 %v2834_v51 }
 0x2d1   :  { %1146 = vmatprep.subr.bf16.mxu1 %v2737_v11  ;;  %1187 = vmatprep.subr.bf16.mxu0 %v2739_v12 }
 0x353   :  { %v683_v52 = vpop.f32.mrf.mxu1  ;;  %v724_v53 = vpop.f32.mrf.mxu0 }
 0x354   :  { %v2890_v4 = vadd.f32 %v683_v52, %v472_v2 }
 0x355   :  { %v685_v54 = vpop.f32.mrf.mxu1  ;;  %v726_v55 = vpop.f32.mrf.mxu0 }
 0x356   :  { %v2892_v7 = vadd.f32 %v685_v54, %v476_v3  ;;  %v479_v54 = vsub.s32 2, %v2879_v61 }
 0x357   :  { %v687_v56 = vpop.f32.mrf.mxu1  ;;  %v728_v57 = vpop.f32.mrf.mxu0 }
 0x358   :  { %v2900_v56 = vadd.f32 %v726_v55, %v484_v22  ;;  %v480_v57 = vrot.slane %v50_v63, %v479_v54 }
 0x359   :  { %v688_v58 = vpop.f32.mrf.mxu1  ;;  %v729_v59 = vpop.f32.mrf.mxu0 }
 0x35a   :  { %v2905_v59 = vadd.f32 %v724_v53, %v480_v57 }
 0x373   :  { %v927_v5 = vpop.f32.mrf.mxu1  ;;  %v968_v6 = vpop.f32.mrf.mxu0 }
 0x374   :  { %v975_v8 = vadd.f32 %v927_v5, %v2890_v4  ;;  %v977_v5 = vadd.f32 %v968_v6, %v2905_v59 }
 0x375   :  { %v929_v10 = vpop.f32.mrf.mxu1  ;;  %v970_v14 = vpop.f32.mrf.mxu0 }
 0x376   :  { %v2164_v15 = vmul.f32 -1.442695, %v975_v8  ;;  %v976_v16 = vadd.f32 %v929_v10, %v2892_v7  ;;  %v978_v58 = vadd.f32 %v970_v14, %v2900_v56 }
 0x377   :  { %v931_v17 = vpop.f32.mrf.mxu1  ;;  %v972_v18 = vpop.f32.mrf.mxu0 }
 0x378   :  { %2450 = vpow2.f32 %v2164_v15  ;;  %v2165_v19 = vmul.f32 -1.442695, %v976_v16  ;;  %v2166_v2 = vmul.f32 -1.442695, %v978_v58 }
 0x379   :  { %v932_v25 = vpop.f32.mrf.mxu1  ;;  %v973_v52 = vpop.f32.mrf.mxu0 }
 0x37a   :  { %2452 = vpow2.f32 %v2165_v19 }
 0x37b   :  { %2454 = vpow2.f32 %v2166_v2 }
 0x385   :  { %v2451_v3 = vpop.eup %2450 }
 0x386   :  { %v982_v8 = vadd.f32 1.0, %v2451_v3 }
 0x387   :  { %v2453_v10 = vpop.eup %2452 }
 0x388   :  { %2456 = vrcp.f32 %v982_v8  ;;  %v988_v15 = vadd.f32 1.0, %v2453_v10  ;;  %v2455_v55 = vpop.eup %2454 }
 0x389   :  { %2458 = vtanh.f32 %v977_v5  ;;  %v995_v63 = vadd.f32 1.0, %v2455_v55 }
 0x38a   :  { %2460 = vrcp.f32 %v988_v15 }
 0x38b   :  { %2462 = vrcp.f32 %v995_v63 }
 0x395   :  { %v2457_v16 = vpop.eup %2456 }
 0x396   :  { %v2459_v17 = vpop.eup %2458 }
 0x397   :  { %v2461_v18 = vpop.eup %2460  ;;  %v999_v14 = vmul.f32 %v2459_v17, %v2457_v16 }
 0x398   :  { %v998_v19 = vmul.f32 0.0, %v2461_v18  ;;  %v2463_v6 = vpop.eup %2462 }
 0x39a   :  { %v2908_v53 = vadd.f32 %v999_v14, %v998_v19 }
 0x39c   :  { %2464 = vtanh.f32 %v2908_v53 }
 0x3a9   :  { %v2465_v22 = vpop.eup %2464 }
 0x3aa   :  { %v2911_v25 = vmul.f32 %v2465_v22, %v2463_v6 }
 0x3ac   :  { %v1009_v52 = vpack.c.bf16 %v2911_v25, %v2911_v25 }
 0x3ae   :  { %1043 = vmatmul.mubr.bf16.vlgmr.msra.gmra.mxu1 %v1009_v52  ;;  %1084 = vmatmul.mubr.bf16.vlgmr.msra.gmra.mxu0 %v1009_v52 }
 0x3af   :  { %1147 = vmatpush1.bf16.msra.mxu1 %v2748_v20  ;;  %1188 = vmatpush1.bf16.msra.mxu0 %v2750_v21 }
 0x3b0   :  { %1148 = vmatprep.subr.bf16.mxu1 %v2752_v23  ;;  %1189 = vmatprep.subr.bf16.mxu0 %v2754_v24 }
 0x3b1   :  { %1178 = vmatprep.mubr.bf16.mxu1 %v2666_v13  ;;  %1219 = vmatprep.mubr.bf16.mxu0 %v2666_v13 }
 0x3b3   :  { %1149 = vmatpush1.bf16.msra.mxu1 %v2758_v26  ;;  %1190 = vmatpush1.bf16.msra.mxu0 %v2760_v27 }
 0x3b4   :  { %1150 = vmatprep.subr.bf16.mxu1 %v2764_v28  ;;  %1191 = vmatprep.subr.bf16.mxu0 %v2766_v29 }
 0x3b7   :  { %1151 = vmatpush1.bf16.msra.mxu1 %v2772_v30  ;;  %1192 = vmatpush1.bf16.msra.mxu0 %v2774_v31 }
 0x3b8   :  { %1152 = vmatprep.subr.bf16.mxu1 %v2778_v32  ;;  %1193 = vmatprep.subr.bf16.mxu0 %v2780_v33 }
 0x3bb   :  { %1153 = vmatpush1.bf16.msra.mxu1 %v2784_v34  ;;  %1194 = vmatpush1.bf16.msra.mxu0 %v2786_v35 }
 0x3bc   :  { %1154 = vmatprep.subr.bf16.mxu1 %v2790_v36  ;;  %1195 = vmatprep.subr.bf16.mxu0 %v2792_v37 }
 0x3bf   :  { %1155 = vmatpush1.bf16.msra.mxu1 %v2796_v38  ;;  %1196 = vmatpush1.bf16.msra.mxu0 %v2798_v39 }
 0x3c0   :  { %1156 = vmatprep.subr.bf16.mxu1 %v2802_v40  ;;  %1197 = vmatprep.subr.bf16.mxu0 %v2804_v41 }
 0x3c3   :  { %1157 = vmatpush1.bf16.msra.mxu1 %v2808_v42  ;;  %1198 = vmatpush1.bf16.msra.mxu0 %v2810_v43 }
 0x3c4   :  { %1158 = vmatprep.subr.bf16.mxu1 %v2814_v44  ;;  %1199 = vmatprep.subr.bf16.mxu0 %v2816_v45 }
 0x3c7   :  { %1159 = vmatpush1.bf16.msra.mxu1 %v2820_v46  ;;  %1200 = vmatpush1.bf16.msra.mxu0 %v2822_v47 }
 0x3c8   :  { %1160 = vmatprep.subr.bf16.mxu1 %v2826_v48  ;;  %1201 = vmatprep.subr.bf16.mxu0 %v2828_v49 }
 0x3cb   :  { %1161 = vmatpush1.bf16.msra.mxu1 %v2832_v50  ;;  %1202 = vmatpush1.bf16.msra.mxu0 %v2834_v51 }
 0x3cc   :  { %1281 = vmatprep.subr.bf16.mxu1 %v2737_v11  ;;  %1322 = vmatprep.subr.bf16.mxu0 %v2739_v12 }
 0x46e   :  { %v1044_v57 = vpop.f32.mrf.mxu1  ;;  %v1085_v58 = vpop.f32.mrf.mxu0 }
 0x46f   :  { %v1096_v2 = vrot.slane %v1044_v57, 7  ;;  %v1098_v22 = vrot.slane %v1085_v58, 7 }
 0x470   :  { %v1046_v3 = vpop.f32.mrf.mxu1  ;;  %v1087_v5 = vpop.f32.mrf.mxu0 }
 0x471   :  { %v1104_v8 = vadd.f32 %v1096_v2, %v2890_v4  ;;  %v1097_v10 = vrot.slane %v1046_v3, 7  ;;  %v1099_v14 = vrot.slane %v1087_v5, 7  ;;  %v1106_v60 = vadd.f32 %v1098_v22, %v2905_v59 }
 0x472   :  { %v1048_v15 = vpop.f32.mrf.mxu1  ;;  %v1089_v55 = vpop.f32.mrf.mxu0 }
 0x473   :  { %v2167_v16 = vmul.f32 -1.442695, %v1104_v8  ;;  %v1105_v17 = vadd.f32 %v1097_v10, %v2892_v7  ;;  %v1107_v6 = vadd.f32 %v1099_v14, %v2900_v56 }
 0x474   :  { %v1049_v18 = vpop.f32.mrf.mxu1  ;;  %v1090_v63 = vpop.f32.mrf.mxu0 }
 0x475   :  { %2466 = vpow2.f32 %v2167_v16  ;;  %v2168_v19 = vmul.f32 -1.442695, %v1105_v17  ;;  %v2169_v52 = vmul.f32 -1.442695, %v1107_v6  ;;  %v1128_v16 = vrot.slane %v2908_v53, 7 }
 0x477   :  { %2468 = vpow2.f32 %v2168_v19 }
 0x478   :  { %2470 = vpow2.f32 %v2169_v52 }
 0x482   :  { %v2467_v57 = vpop.eup %2466 }
 0x483   :  { %v1111_v2 = vadd.f32 1.0, %v2467_v57 }
 0x484   :  { %v2469_v3 = vpop.eup %2468 }
 0x485   :  { %2472 = vrcp.f32 %v1111_v2  ;;  %v1117_v8 = vadd.f32 1.0, %v2469_v3  ;;  %v2471_v10 = vpop.eup %2470 }
 0x486   :  { %2474 = vtanh.f32 %v1106_v60  ;;  %v1124_v17 = vadd.f32 1.0, %v2471_v10  ;;  %v1007_v60 = vrot.slane %v2911_v25, %v471_v62 }
 0x487   :  { %2476 = vrcp.f32 %v1117_v8 }
 0x488   :  { %2478 = vrcp.f32 %v1124_v17  ;;  %v1008_v52 = vsel %vm1003_vm1, %v1007_v60, 0.0 }
 0x492   :  { %v2473_v15 = vpop.eup %2472 }
 0x493   :  { %v2475_v55 = vpop.eup %2474 }
 0x494   :  { %v2477_v5 = vpop.eup %2476  ;;  %v1131_v18 = vmul.f32 %v2475_v55, %v2473_v15 }
 0x495   :  { %v1130_v58 = vmul.f32 %v2477_v5, %v1128_v16  ;;  %v2479_v19 = vpop.eup %2478 }
 0x497   :  { %v2954_v63 = vadd.f32 %v1131_v18, %v1130_v58 }
 0x499   :  { %2480 = vtanh.f32 %v2954_v63 }
 0x4a6   :  { %v2481_v14 = vpop.eup %2480 }
 0x4a7   :  { %v1134_v6 = vmul.f32 %v2481_v14, %v2479_v19 }
 0x4a9   :  { %v1139_v53 = vrot.slane %v1134_v6, %v475_v1  ;;  %v1141_v22 = vpack.c.bf16 %v1134_v6, %v1134_v6 }
 0x4ab   :  { %v2964_v57 = vsel %vm1135_vm2, %v1139_v53, %v1008_v52  ;;  %v1143_v2 = vshrl.u32 %v1141_v22, 16 }
 0x4ad   :  { %1179 = vmatmul.mubr.bf16.vlgmr.msra.gmra.mxu1 %v1143_v2  ;;  %1220 = vmatmul.mubr.bf16.vlgmr.msra.gmra.mxu0 %v1143_v2 }
 0x4ae   :  { %1282 = vmatpush1.bf16.msra.mxu1 %v2748_v20  ;;  %1323 = vmatpush1.bf16.msra.mxu0 %v2750_v21 }
 0x4af   :  { %1283 = vmatprep.subr.bf16.mxu1 %v2752_v23  ;;  %1324 = vmatprep.subr.bf16.mxu0 %v2754_v24 }
 0x4b0   :  { %1313 = vmatprep.mubr.bf16.mxu1 %v2666_v13  ;;  %1354 = vmatprep.mubr.bf16.mxu0 %v2666_v13 }
 0x4b2   :  { %1284 = vmatpush1.bf16.msra.mxu1 %v2758_v26  ;;  %1325 = vmatpush1.bf16.msra.mxu0 %v2760_v27 }
 0x4b3   :  { %1285 = vmatprep.subr.bf16.mxu1 %v2764_v28  ;;  %1326 = vmatprep.subr.bf16.mxu0 %v2766_v29 }
 0x4b6   :  { %1286 = vmatpush1.bf16.msra.mxu1 %v2772_v30  ;;  %1327 = vmatpush1.bf16.msra.mxu0 %v2774_v31 }
 0x4b7   :  { %1287 = vmatprep.subr.bf16.mxu1 %v2778_v32  ;;  %1328 = vmatprep.subr.bf16.mxu0 %v2780_v33 }
 0x4ba   :  { %1288 = vmatpush1.bf16.msra.mxu1 %v2784_v34  ;;  %1329 = vmatpush1.bf16.msra.mxu0 %v2786_v35 }
 0x4bb   :  { %1289 = vmatprep.subr.bf16.mxu1 %v2790_v36  ;;  %1330 = vmatprep.subr.bf16.mxu0 %v2792_v37 }
 0x4be   :  { %1290 = vmatpush1.bf16.msra.mxu1 %v2796_v38  ;;  %1331 = vmatpush1.bf16.msra.mxu0 %v2798_v39 }
 0x4bf   :  { %1291 = vmatprep.subr.bf16.mxu1 %v2802_v40  ;;  %1332 = vmatprep.subr.bf16.mxu0 %v2804_v41 }
 0x4c2   :  { %1292 = vmatpush1.bf16.msra.mxu1 %v2808_v42  ;;  %1333 = vmatpush1.bf16.msra.mxu0 %v2810_v43 }
 0x4c3   :  { %1293 = vmatprep.subr.bf16.mxu1 %v2814_v44  ;;  %1334 = vmatprep.subr.bf16.mxu0 %v2816_v45 }
 0x4c6   :  { %1294 = vmatpush1.bf16.msra.mxu1 %v2820_v46  ;;  %1335 = vmatpush1.bf16.msra.mxu0 %v2822_v47 }
 0x4c7   :  { %1295 = vmatprep.subr.bf16.mxu1 %v2826_v48  ;;  %1336 = vmatprep.subr.bf16.mxu0 %v2828_v49 }
 0x4ca   :  { %1296 = vmatpush1.bf16.msra.mxu1 %v2832_v50  ;;  %1337 = vmatpush1.bf16.msra.mxu0 %v2834_v51 }
 0x4cb   :  { %1418 = vmatprep.subr.bf16.mxu1 %v2737_v11  ;;  %1459 = vmatprep.subr.bf16.mxu0 %v2739_v12 }
 0x56d   :  { %v1180_v62 = vpop.f32.mrf.mxu1  ;;  %v1221_v1 = vpop.f32.mrf.mxu0 }
 0x56e   :  { %v1232_v25 = vrot.slane %v1180_v62, 6  ;;  %v1234_v6 = vrot.slane %v1221_v1, 6 }
 0x56f   :  { %v1182_v3 = vpop.f32.mrf.mxu1  ;;  %v1223_v8 = vpop.f32.mrf.mxu0 }
 0x570   :  { %v1240_v10 = vadd.f32 %v1232_v25, %v2890_v4  ;;  %v1233_v15 = vrot.slane %v1182_v3, 6  ;;  %v1235_v14 = vrot.slane %v1223_v8, 6  ;;  %v1242_v52 = vadd.f32 %v1234_v6, %v2905_v59 }
 0x571   :  { %v1184_v55 = vpop.f32.mrf.mxu1  ;;  %v1225_v16 = vpop.f32.mrf.mxu0 }
 0x572   :  { %v2170_v5 = vmul.f32 -1.442695, %v1240_v10  ;;  %v1241_v17 = vadd.f32 %v1233_v15, %v2892_v7  ;;  %v1243_v60 = vadd.f32 %v1235_v14, %v2900_v56  ;;  %v1264_v55 = vrot.slane %v2954_v63, 7 }
 0x573   :  { %v1185_v18 = vpop.f32.mrf.mxu1  ;;  %v1226_v58 = vpop.f32.mrf.mxu0 }
 0x574   :  { %2482 = vpow2.f32 %v2170_v5  ;;  %v2171_v19 = vmul.f32 -1.442695, %v1241_v17  ;;  %v2172_v53 = vmul.f32 -1.442695, %v1243_v60 }
 0x576   :  { %2484 = vpow2.f32 %v2171_v19 }
 0x577   :  { %2486 = vpow2.f32 %v2172_v53 }
 0x581   :  { %v2483_v22 = vpop.eup %2482 }
 0x582   :  { %v1247_v2 = vadd.f32 1.0, %v2483_v22 }
 0x583   :  { %v2485_v62 = vpop.eup %2484 }
 0x584   :  { %2488 = vrcp.f32 %v1247_v2  ;;  %v1253_v25 = vadd.f32 1.0, %v2485_v62  ;;  %v2487_v3 = vpop.eup %2486 }
 0x585   :  { %2490 = vtanh.f32 %v1242_v52  ;;  %v1260_v16 = vadd.f32 1.0, %v2487_v3 }
 0x586   :  { %2492 = vrcp.f32 %v1253_v25 }
 0x587   :  { %2494 = vrcp.f32 %v1260_v16 }
 0x591   :  { %v2489_v10 = vpop.eup %2488 }
 0x592   :  { %v2491_v15 = vpop.eup %2490 }
 0x593   :  { %v2493_v8 = vpop.eup %2492  ;;  %v1267_v5 = vmul.f32 %v2491_v15, %v2489_v10 }
 0x594   :  { %v1266_v1 = vmul.f32 %v2493_v8, %v1264_v55  ;;  %v2495_v18 = vpop.eup %2494 }
 0x596   :  { %v3005_v17 = vadd.f32 %v1267_v5, %v1266_v1 }
 0x598   :  { %2496 = vtanh.f32 %v3005_v17 }
 0x5a5   :  { %v2497_v58 = vpop.eup %2496 }
 0x5a6   :  { %v1270_v19 = vmul.f32 %v2497_v58, %v2495_v18 }
 0x5a8   :  { %v1275_v14 = vrot.slane %v1270_v19, %v479_v54  ;;  %v1277_v60 = vpack.c.bf16 %v1270_v19, %v1270_v19 }
 0x5aa   :  { %v3012_v63 = vsel %vm1271_vm3, %v1275_v14, %v2964_v57  ;;  %v1279_v6 = vrot.slane %v1277_v60, 1 }
 0x5ac   :  { %1314 = vmatmul.mubr.bf16.vlgmr.msra.gmra.mxu1 %v1279_v6  ;;  %1355 = vmatmul.mubr.bf16.vlgmr.msra.gmra.mxu0 %v1279_v6 }
 0x5ad   :  { %1419 = vmatpush1.bf16.msra.mxu1 %v2748_v20  ;;  %1460 = vmatpush1.bf16.msra.mxu0 %v2750_v21 }
 0x5ae   :  { %1420 = vmatprep.subr.bf16.mxu1 %v2752_v23  ;;  %1461 = vmatprep.subr.bf16.mxu0 %v2754_v24 }
 0x5af   :  { %1450 = vmatprep.mubr.bf16.mxu1 %v2666_v13  ;;  %1491 = vmatprep.mubr.bf16.mxu0 %v2666_v13 }
 0x5b1   :  { %1421 = vmatpush1.bf16.msra.mxu1 %v2758_v26  ;;  %1462 = vmatpush1.bf16.msra.mxu0 %v2760_v27 }
 0x5b2   :  { %1422 = vmatprep.subr.bf16.mxu1 %v2764_v28  ;;  %1463 = vmatprep.subr.bf16.mxu0 %v2766_v29 }
 0x5b5   :  { %1423 = vmatpush1.bf16.msra.mxu1 %v2772_v30  ;;  %1464 = vmatpush1.bf16.msra.mxu0 %v2774_v31 }
 0x5b6   :  { %1424 = vmatprep.subr.bf16.mxu1 %v2778_v32  ;;  %1465 = vmatprep.subr.bf16.mxu0 %v2780_v33 }
 0x5b9   :  { %1425 = vmatpush1.bf16.msra.mxu1 %v2784_v34  ;;  %1466 = vmatpush1.bf16.msra.mxu0 %v2786_v35 }
 0x5ba   :  { %1426 = vmatprep.subr.bf16.mxu1 %v2790_v36  ;;  %1467 = vmatprep.subr.bf16.mxu0 %v2792_v37 }
 0x5bd   :  { %1427 = vmatpush1.bf16.msra.mxu1 %v2796_v38  ;;  %1468 = vmatpush1.bf16.msra.mxu0 %v2798_v39 }
 0x5be   :  { %1428 = vmatprep.subr.bf16.mxu1 %v2802_v40  ;;  %1469 = vmatprep.subr.bf16.mxu0 %v2804_v41 }
 0x5c1   :  { %1429 = vmatpush1.bf16.msra.mxu1 %v2808_v42  ;;  %1470 = vmatpush1.bf16.msra.mxu0 %v2810_v43 }
 0x5c2   :  { %1430 = vmatprep.subr.bf16.mxu1 %v2814_v44  ;;  %1471 = vmatprep.subr.bf16.mxu0 %v2816_v45 }
 0x5c5   :  { %1431 = vmatpush1.bf16.msra.mxu1 %v2820_v46  ;;  %1472 = vmatpush1.bf16.msra.mxu0 %v2822_v47 }
 0x5c6   :  { %1432 = vmatprep.subr.bf16.mxu1 %v2826_v48  ;;  %1473 = vmatprep.subr.bf16.mxu0 %v2828_v49 }
 0x5c9   :  { %1433 = vmatpush1.bf16.msra.mxu1 %v2832_v50  ;;  %1474 = vmatpush1.bf16.msra.mxu0 %v2834_v51 }
 0x5ca   :  { %1553 = vmatprep.subr.bf16.mxu1 %v2737_v11  ;;  %1594 = vmatprep.subr.bf16.mxu0 %v2739_v12 }
 0x66c   :  { %v1315_v54 = vpop.f32.mrf.mxu1  ;;  %v1356_v57 = vpop.f32.mrf.mxu0 }
 0x66d   :  { %v1367_v53 = vrot.slane %v1315_v54, 5  ;;  %v1369_v18 = vrot.slane %v1356_v57, 5 }
 0x66e   :  { %v1317_v22 = vpop.f32.mrf.mxu1  ;;  %v1358_v52 = vpop.f32.mrf.mxu0 }
 0x66f   :  { %v1375_v2 = vadd.f32 %v1367_v53, %v2890_v4  ;;  %v1368_v62 = vrot.slane %v1317_v22, 5  ;;  %v1370_v5 = vrot.slane %v1358_v52, 5  ;;  %v1377_v14 = vadd.f32 %v1369_v18, %v2905_v59 }
 0x670   :  { %v1319_v25 = vpop.f32.mrf.mxu1  ;;  %v1360_v3 = vpop.f32.mrf.mxu0 }
 0x671   :  { %v2173_v10 = vmul.f32 -1.442695, %v1375_v2  ;;  %v1376_v15 = vadd.f32 %v1368_v62, %v2892_v7  ;;  %v1378_v1 = vadd.f32 %v1370_v5, %v2900_v56  ;;  %v1399_v62 = vrot.slane %v3005_v17, 7 }
 0x672   :  { %v1320_v55 = vpop.f32.mrf.mxu1  ;;  %v1361_v8 = vpop.f32.mrf.mxu0 }
 0x673   :  { %2498 = vpow2.f32 %v2173_v10  ;;  %v2174_v16 = vmul.f32 -1.442695, %v1376_v15  ;;  %v2175_v58 = vmul.f32 -1.442695, %v1378_v1 }
 0x675   :  { %2500 = vpow2.f32 %v2174_v16 }
 0x676   :  { %2502 = vpow2.f32 %v2175_v58 }
 0x680   :  { %v2499_v19 = vpop.eup %2498 }
 0x681   :  { %v1382_v60 = vadd.f32 1.0, %v2499_v19 }
 0x682   :  { %v2501_v6 = vpop.eup %2500 }
 0x683   :  { %2504 = vrcp.f32 %v1382_v60  ;;  %v1388_v54 = vadd.f32 1.0, %v2501_v6  ;;  %v2503_v53 = vpop.eup %2502 }
 0x684   :  { %2506 = vtanh.f32 %v1377_v14  ;;  %v1395_v25 = vadd.f32 1.0, %v2503_v53 }
 0x685   :  { %2508 = vrcp.f32 %v1388_v54 }
 0x686   :  { %2510 = vrcp.f32 %v1395_v25 }
 0x690   :  { %v2505_v22 = vpop.eup %2504 }
 0x691   :  { %v2507_v2 = vpop.eup %2506 }
 0x692   :  { %v2509_v52 = vpop.eup %2508  ;;  %v1402_v3 = vmul.f32 %v2507_v2, %v2505_v22 }
 0x693   :  { %v1401_v57 = vmul.f32 %v2509_v52, %v1399_v62  ;;  %v2511_v15 = vpop.eup %2510 }
 0x695   :  { %v3053_v10 = vadd.f32 %v1402_v3, %v1401_v57 }
 0x697   :  { %2512 = vtanh.f32 %v3053_v10 }
 0x6a4   :  { %v2513_v55 = vpop.eup %2512 }
 0x6a5   :  { %v1405_v8 = vmul.f32 %v2513_v55, %v2511_v15 }
 0x6a7   :  { %v1410_v16 = vrot.slane %v1405_v8, %v483_v9  ;;  %v1412_v5 = vpack.c.bf16 %v1405_v8, %v1405_v8 }
 0x6a9   :  { %v1414_v1 = vshrl.u32 %v1412_v5, 16  ;;  %v3060_v17 = vsel %vm1406_vm4, %v1410_v16, %v3012_v63 }
 0x6ab   :  { %v1416_v18 = vrot.slane %v1414_v1, 1 }
 0x6ad   :  { %1451 = vmatmul.mubr.bf16.vlgmr.msra.gmra.mxu1 %v1416_v18  ;;  %1492 = vmatmul.mubr.bf16.vlgmr.msra.gmra.mxu0 %v1416_v18 }
 0x6ae   :  { %1554 = vmatpush1.bf16.msra.mxu1 %v2748_v20  ;;  %1595 = vmatpush1.bf16.msra.mxu0 %v2750_v21 }
 0x6af   :  { %1555 = vmatprep.subr.bf16.mxu1 %v2752_v23  ;;  %1596 = vmatprep.subr.bf16.mxu0 %v2754_v24 }
 0x6b0   :  { %1585 = vmatprep.mubr.bf16.mxu1 %v2666_v13  ;;  %1626 = vmatprep.mubr.bf16.mxu0 %v2666_v13 }
 0x6b2   :  { %1556 = vmatpush1.bf16.msra.mxu1 %v2758_v26  ;;  %1597 = vmatpush1.bf16.msra.mxu0 %v2760_v27 }
 0x6b3   :  { %1557 = vmatprep.subr.bf16.mxu1 %v2764_v28  ;;  %1598 = vmatprep.subr.bf16.mxu0 %v2766_v29 }
 0x6b6   :  { %1558 = vmatpush1.bf16.msra.mxu1 %v2772_v30  ;;  %1599 = vmatpush1.bf16.msra.mxu0 %v2774_v31 }
 0x6b7   :  { %1559 = vmatprep.subr.bf16.mxu1 %v2778_v32  ;;  %1600 = vmatprep.subr.bf16.mxu0 %v2780_v33 }
 0x6ba   :  { %1560 = vmatpush1.bf16.msra.mxu1 %v2784_v34  ;;  %1601 = vmatpush1.bf16.msra.mxu0 %v2786_v35 }
 0x6bb   :  { %1561 = vmatprep.subr.bf16.mxu1 %v2790_v36  ;;  %1602 = vmatprep.subr.bf16.mxu0 %v2792_v37 }
 0x6be   :  { %1562 = vmatpush1.bf16.msra.mxu1 %v2796_v38  ;;  %1603 = vmatpush1.bf16.msra.mxu0 %v2798_v39 }
 0x6bf   :  { %1563 = vmatprep.subr.bf16.mxu1 %v2802_v40  ;;  %1604 = vmatprep.subr.bf16.mxu0 %v2804_v41 }
 0x6c2   :  { %1564 = vmatpush1.bf16.msra.mxu1 %v2808_v42  ;;  %1605 = vmatpush1.bf16.msra.mxu0 %v2810_v43 }
 0x6c3   :  { %1565 = vmatprep.subr.bf16.mxu1 %v2814_v44  ;;  %1606 = vmatprep.subr.bf16.mxu0 %v2816_v45 }
 0x6c6   :  { %1566 = vmatpush1.bf16.msra.mxu1 %v2820_v46  ;;  %1607 = vmatpush1.bf16.msra.mxu0 %v2822_v47 }
 0x6c7   :  { %1567 = vmatprep.subr.bf16.mxu1 %v2826_v48  ;;  %1608 = vmatprep.subr.bf16.mxu0 %v2828_v49 }
 0x6ca   :  { %1568 = vmatpush1.bf16.msra.mxu1 %v2832_v50  ;;  %1609 = vmatpush1.bf16.msra.mxu0 %v2834_v51 }
 0x6cb   :  { %1690 = vmatprep.subr.bf16.mxu1 %v2737_v11  ;;  %1731 = vmatprep.subr.bf16.mxu0 %v2739_v12 }
 0x76d   :  { %v1452_v9 = vpop.f32.mrf.mxu1  ;;  %v1493_v63 = vpop.f32.mrf.mxu0 }
 0x76e   :  { %v1504_v58 = vrot.slane %v1452_v9, 4  ;;  %v1506_v3 = vrot.slane %v1493_v63, 4 }
 0x76f   :  { %v1454_v19 = vpop.f32.mrf.mxu1  ;;  %v1495_v14 = vpop.f32.mrf.mxu0 }
 0x770   :  { %v1512_v60 = vadd.f32 %v1504_v58, %v2890_v4  ;;  %v1505_v6 = vrot.slane %v1454_v19, 4  ;;  %v1507_v11 = vrot.slane %v1495_v14, 4  ;;  %v1514_v55 = vadd.f32 %v1506_v3, %v2905_v59 }
 0x771   :  { %v1456_v54 = vpop.f32.mrf.mxu1  ;;  %v1497_v53 = vpop.f32.mrf.mxu0  ;;  %v1536_v58 = vrot.slane %v3053_v10, 7 }
 0x772   :  { %v2176_v22 = vmul.f32 -1.442695, %v1512_v60  ;;  %v1513_v2 = vadd.f32 %v1505_v6, %v2892_v7  ;;  %v1515_v12 = vadd.f32 %v1507_v11, %v2900_v56  ;;  %v1546_v53 = vsub.s32 4, %v2879_v61 }
 0x773   :  { %v1457_v62 = vpop.f32.mrf.mxu1  ;;  %v1498_v52 = vpop.f32.mrf.mxu0 }
 0x774   :  { %2514 = vpow2.f32 %v2176_v22  ;;  %v2177_v25 = vmul.f32 -1.442695, %v1513_v2  ;;  %v2178_v57 = vmul.f32 -1.442695, %v1515_v12 }
 0x776   :  { %2516 = vpow2.f32 %v2177_v25 }
 0x777   :  { %2518 = vpow2.f32 %v2178_v57 }
 0x781   :  { %v2515_v15 = vpop.eup %2514 }
 0x782   :  { %v1519_v8 = vadd.f32 1.0, %v2515_v15  ;;  %v1681_v15 = vsub.s32 5, %v2879_v61 }
 0x783   :  { %v2517_v16 = vpop.eup %2516 }
 0x784   :  { %2520 = vrcp.f32 %v1519_v8  ;;  %v1525_v5 = vadd.f32 1.0, %v2517_v16  ;;  %v2519_v1 = vpop.eup %2518 }
 0x785   :  { %2522 = vtanh.f32 %v1514_v55  ;;  %v1532_v14 = vadd.f32 1.0, %v2519_v1 }
 0x786   :  { %2524 = vrcp.f32 %v1525_v5 }
 0x787   :  { %2526 = vrcp.f32 %v1532_v14  ;;  %v2586_v14 = vld [vmem:[#allocation4 + $0x1c4] ss:$16 sps:$4 sm:$0xff]  }
 0x791   :  { %v2521_v18 = vpop.eup %2520 }
 0x792   :  { %v2523_v9 = vpop.eup %2522 }
 0x793   :  { %v2525_v19 = vpop.eup %2524  ;;  %v1539_v60 = vmul.f32 %v2523_v9, %v2521_v18 }
 0x794   :  { %v1538_v63 = vmul.f32 %v2525_v19, %v1536_v58  ;;  %v2527_v54 = vpop.eup %2526  ;;  %v2584_v58 = vld [vmem:[#allocation4 + $0x1e0] ss:$16 sps:$4 sm:$0xff]   ;;  %v2585_v19 = vld [vmem:[#allocation4 + $0x1e8] ss:$16 sps:$4 sm:$0xff]  }
 0x796   :  { %v3101_v6 = vadd.f32 %v1539_v60, %v1538_v63  ;;  %v2587_v60 = vld [vmem:[#allocation4 + $0x1cc] ss:$16 sps:$4 sm:$0xff]   ;;  %v2588_v63 = vld [vmem:[#allocation4 + $0x1c0] ss:$16 sps:$4 sm:$0xff]  }
 0x798   :  { %2528 = vtanh.f32 %v3101_v6 }
 0x7a5   :  { %v2529_v22 = vpop.eup %2528 }
 0x7a6   :  { %v1542_v2 = vmul.f32 %v2529_v22, %v2527_v54  ;;  %v2590_v54 = vld [vmem:[#allocation4 + $0x1a4] ss:$16 sps:$4 sm:$0xff]   ;;  %v2592_v22 = vld [vmem:[#allocation4 + $0x1a0] ss:$16 sps:$4 sm:$0xff]  }
 0x7a8   :  { %v1547_v62 = vrot.slane %v1542_v2, %v1546_v53  ;;  %v1549_v52 = vpack.c.bf16 %v1542_v2, %v1542_v2  ;;  %v2591_v53 = vld [vmem:[#allocation4 + $0x1ac] ss:$16 sps:$4 sm:$0xff]   ;;  %v2593_v2 = vld [vmem:[#allocation4 + $0x1a8] ss:$16 sps:$4 sm:$0xff]  }
 0x7aa   :  { %v1551_v25 = vrot.slane %v1549_v52, 2  ;;  %v3107_v10 = vsel %vm1543_vm5, %v1547_v62, %v3060_v17  ;;  %v2594_v62 = vld [vmem:[#allocation4 + $0x184] ss:$16 sps:$4 sm:$0xff]   ;;  %v2595_v52 = vld [vmem:[#allocation4 + $0x18c] ss:$16 sps:$4 sm:$0xff]  }
 0x7ac   :  { %1586 = vmatmul.mubr.bf16.vlgmr.msra.gmra.mxu1 %v1551_v25  ;;  %1627 = vmatmul.mubr.bf16.vlgmr.msra.gmra.mxu0 %v1551_v25  ;;  %v2596_v25 = vld [vmem:[#allocation4 + $0x180] ss:$16 sps:$4 sm:$0xff]  }
 0x7ad   :  { %1691 = vmatpush1.bf16.msra.mxu1 %v2748_v20  ;;  %1732 = vmatpush1.bf16.msra.mxu0 %v2750_v21  ;;  %v2582_v20 = vld [vmem:[#allocation4 + $0x1e4] ss:$16 sps:$4 sm:$0xff]   ;;  %v2583_v21 = vld [vmem:[#allocation4 + $0x1ec] ss:$16 sps:$4 sm:$0xff]  }
 0x7ae   :  { %1692 = vmatprep.subr.bf16.mxu1 %v2752_v23  ;;  %1733 = vmatprep.subr.bf16.mxu0 %v2754_v24 }
 0x7af   :  { %1722 = vmatprep.mubr.bf16.mxu1 %v2666_v13  ;;  %1763 = vmatprep.mubr.bf16.mxu0 %v2666_v13 }
 0x7b1   :  { %1693 = vmatpush1.bf16.msra.mxu1 %v2758_v26  ;;  %1734 = vmatpush1.bf16.msra.mxu0 %v2760_v27 }
 0x7b2   :  { %1694 = vmatprep.subr.bf16.mxu1 %v2764_v28  ;;  %1735 = vmatprep.subr.bf16.mxu0 %v2766_v29 }
 0x7b5   :  { %1695 = vmatpush1.bf16.msra.mxu1 %v2772_v30  ;;  %1736 = vmatpush1.bf16.msra.mxu0 %v2774_v31 }
 0x7b6   :  { %1696 = vmatprep.subr.bf16.mxu1 %v2778_v32  ;;  %1737 = vmatprep.subr.bf16.mxu0 %v2780_v33 }
 0x7b9   :  { %1697 = vmatpush1.bf16.msra.mxu1 %v2784_v34  ;;  %1738 = vmatpush1.bf16.msra.mxu0 %v2786_v35 }
 0x7ba   :  { %1698 = vmatprep.subr.bf16.mxu1 %v2790_v36  ;;  %1739 = vmatprep.subr.bf16.mxu0 %v2792_v37 }
 0x7bd   :  { %1699 = vmatpush1.bf16.msra.mxu1 %v2796_v38  ;;  %1740 = vmatpush1.bf16.msra.mxu0 %v2798_v39 }
 0x7be   :  { %1700 = vmatprep.subr.bf16.mxu1 %v2802_v40  ;;  %1741 = vmatprep.subr.bf16.mxu0 %v2804_v41 }
 0x7c1   :  { %1701 = vmatpush1.bf16.msra.mxu1 %v2808_v42  ;;  %1742 = vmatpush1.bf16.msra.mxu0 %v2810_v43 }
 0x7c2   :  { %1702 = vmatprep.subr.bf16.mxu1 %v2814_v44  ;;  %1743 = vmatprep.subr.bf16.mxu0 %v2816_v45 }
 0x7c5   :  { %1703 = vmatpush1.bf16.msra.mxu1 %v2820_v46  ;;  %1744 = vmatpush1.bf16.msra.mxu0 %v2822_v47 }
 0x7c6   :  { %1704 = vmatprep.subr.bf16.mxu1 %v2826_v48  ;;  %1745 = vmatprep.subr.bf16.mxu0 %v2828_v49 }
 0x7c9   :  { %1705 = vmatpush1.bf16.msra.mxu1 %v2832_v50  ;;  %1746 = vmatpush1.bf16.msra.mxu0 %v2834_v51  ;;  %v1671_v50 = vrot.slane %v3101_v6, 7  ;;  %v2589_v6 = vld [vmem:[#allocation4 + $0x1c8] ss:$16 sps:$4 sm:$0xff]  }
 0x7ca   :  { %1825 = vmatprep.subr.bf16.mxu1 %v2582_v20  ;;  %1866 = vmatprep.subr.bf16.mxu0 %v2583_v21  ;;  %v2599_v20 = vld [vmem:[#allocation4 + $0x16c] ss:$16 sps:$4 sm:$0xff]   ;;  %v2600_v21 = vld [vmem:[#allocation4 + $0x160] ss:$16 sps:$4 sm:$0xff]  }
 0x86c   :  { %v1587_v23 = vpop.f32.mrf.mxu1  ;;  %v1628_v24 = vpop.f32.mrf.mxu0 }
 0x86d   :  { %v1639_v26 = vrot.slane %v1587_v23, 3  ;;  %v1641_v40 = vrot.slane %v1628_v24, 3  ;;  %v2601_v23 = vld [vmem:[#allocation4 + $0x168] ss:$16 sps:$4 sm:$0xff]   ;;  %v2602_v24 = vld [vmem:[#allocation4 + $0x144] ss:$16 sps:$4 sm:$0xff]  }
 0x86e   :  { %v1589_v27 = vpop.f32.mrf.mxu1  ;;  %v1630_v28 = vpop.f32.mrf.mxu0 }
 0x86f   :  { %v1647_v29 = vadd.f32 %v1639_v26, %v2890_v4  ;;  %v1640_v30 = vrot.slane %v1589_v27, 3  ;;  %v1642_v38 = vrot.slane %v1630_v28, 3  ;;  %v1649_v43 = vadd.f32 %v1641_v40, %v2905_v59  ;;  %v2603_v26 = vld [vmem:[#allocation4 + $0x14c] ss:$16 sps:$4 sm:$0xff]   ;;  %v2604_v27 = vld [vmem:[#allocation4 + $0x140] ss:$16 sps:$4 sm:$0xff]  }
 0x870   :  { %v1591_v31 = vpop.f32.mrf.mxu1  ;;  %v1632_v32 = vpop.f32.mrf.mxu0  ;;  %v2605_v28 = vld [vmem:[#allocation4 + $0x148] ss:$16 sps:$4 sm:$0xff]  }
 0x871   :  { %v2179_v33 = vmul.f32 -1.442695, %v1647_v29  ;;  %v1648_v34 = vadd.f32 %v1640_v30, %v2892_v7  ;;  %v1650_v39 = vadd.f32 %v1642_v38, %v2900_v56  ;;  %v2606_v29 = vld [vmem:[#allocation4 + $0x124] ss:$16 sps:$4 sm:$0xff]   ;;  %v2607_v30 = vld [vmem:[#allocation4 + $0x12c] ss:$16 sps:$4 sm:$0xff]  }
 0x872   :  { %v1592_v35 = vpop.f32.mrf.mxu1  ;;  %v1633_v36 = vpop.f32.mrf.mxu0  ;;  %v2608_v31 = vld [vmem:[#allocation4 + $0x120] ss:$16 sps:$4 sm:$0xff]   ;;  %v2609_v32 = vld [vmem:[#allocation4 + $0x128] ss:$16 sps:$4 sm:$0xff]  }
 0x873   :  { %2530 = vpow2.f32 %v2179_v33  ;;  %v2180_v37 = vmul.f32 -1.442695, %v1648_v34  ;;  %v2181_v41 = vmul.f32 -1.442695, %v1650_v39  ;;  %v2610_v33 = vld [vmem:[#allocation4 + $0x104] ss:$16 sps:$4 sm:$0xff]  }
 0x874   :  { %v2611_v34 = vld [vmem:[#allocation4 + $0x10c] ss:$16 sps:$4 sm:$0xff]   ;;  %v2612_v35 = vld [vmem:[#allocation4 + $0x100] ss:$16 sps:$4 sm:$0xff]   ;;  %v2613_v36 = vld [vmem:[#allocation4 + $0x108] ss:$16 sps:$4 sm:$0xff]  }
 0x875   :  { %2532 = vpow2.f32 %v2180_v37 }
 0x876   :  { %2534 = vpow2.f32 %v2181_v41 }
 0x880   :  { %v2531_v42 = vpop.eup %2530 }
 0x881   :  { %v1654_v44 = vadd.f32 1.0, %v2531_v42 }
 0x882   :  { %v2533_v45 = vpop.eup %2532 }
 0x883   :  { %2536 = vrcp.f32 %v1654_v44  ;;  %v1660_v46 = vadd.f32 1.0, %v2533_v45  ;;  %v2535_v47 = vpop.eup %2534 }
 0x884   :  { %2538 = vtanh.f32 %v1649_v43  ;;  %v1667_v17 = vadd.f32 1.0, %v2535_v47 }
 0x885   :  { %2540 = vrcp.f32 %v1660_v46 }
 0x886   :  { %2542 = vrcp.f32 %v1667_v17 }
 0x890   :  { %v2537_v48 = vpop.eup %2536 }
 0x891   :  { %v2539_v49 = vpop.eup %2538 }
 0x892   :  { %v2541_v51 = vpop.eup %2540  ;;  %v1674_v11 = vmul.f32 %v2539_v49, %v2537_v48 }
 0x893   :  { %v1673_v12 = vmul.f32 %v2541_v51, %v1671_v50  ;;  %v2543_v57 = vpop.eup %2542 }
 0x895   :  { %v3146_v3 = vadd.f32 %v1674_v11, %v1673_v12 }
 0x897   :  { %2544 = vtanh.f32 %v3146_v3 }
 0x8a4   :  { %v2545_v55 = vpop.eup %2544 }
 0x8a5   :  { %v1677_v8 = vmul.f32 %v2545_v55, %v2543_v57 }
 0x8a7   :  { %v1682_v16 = vrot.slane %v1677_v8, %v1681_v15  ;;  %v1684_v5 = vpack.c.bf16 %v1677_v8, %v1677_v8 }
 0x8a9   :  { %v1686_v1 = vshrl.u32 %v1684_v5, 16  ;;  %v3152_v18 = vsel %vm1678_vm6, %v1682_v16, %v3107_v10  ;;  %v2597_v10 = vld [vmem:[#allocation4 + $0x188] ss:$16 sps:$4 sm:$0xff]  }
 0x8ab   :  { %v1688_v9 = vrot.slane %v1686_v1, 2 }
 0x8ad   :  { %1723 = vmatmul.mubr.bf16.vlgmr.msra.gmra.mxu1 %v1688_v9  ;;  %1764 = vmatmul.mubr.bf16.vlgmr.msra.gmra.mxu0 %v1688_v9 }
 0x8ae   :  { %1826 = vmatpush1.bf16.msra.mxu1 %v2584_v58  ;;  %1867 = vmatpush1.bf16.msra.mxu0 %v2585_v19  ;;  %v1808_v58 = vrot.slane %v3146_v3, 7 }
 0x8af   :  { %1827 = vmatprep.subr.bf16.mxu1 %v2586_v14  ;;  %1868 = vmatprep.subr.bf16.mxu0 %v2587_v60 }
 0x8b0   :  { %1857 = vmatprep.mubr.bf16.mxu1 %v2666_v13  ;;  %1898 = vmatprep.mubr.bf16.mxu0 %v2666_v13  ;;  %v2598_v13 = vld [vmem:[#allocation4 + $0x164] ss:$16 sps:$4 sm:$0xff]  }
 0x8b2   :  { %1828 = vmatpush1.bf16.msra.mxu1 %v2588_v63  ;;  %1869 = vmatpush1.bf16.msra.mxu0 %v2589_v6 }
 0x8b3   :  { %1829 = vmatprep.subr.bf16.mxu1 %v2590_v54  ;;  %1870 = vmatprep.subr.bf16.mxu0 %v2591_v53  ;;  %v1818_v53 = vsub.s32 6, %v2879_v61 }
 0x8b6   :  { %1830 = vmatpush1.bf16.msra.mxu1 %v2592_v22  ;;  %1871 = vmatpush1.bf16.msra.mxu0 %v2593_v2 }
 0x8b7   :  { %1831 = vmatprep.subr.bf16.mxu1 %v2594_v62  ;;  %1872 = vmatprep.subr.bf16.mxu0 %v2595_v52 }
 0x8ba   :  { %1832 = vmatpush1.bf16.msra.mxu1 %v2596_v25  ;;  %1873 = vmatpush1.bf16.msra.mxu0 %v2597_v10  ;;  %v2442_v10 = vld [vmem:[#allocation2 + $0xf8] sm:$0xff]  }
 0x8bb   :  { %1833 = vmatprep.subr.bf16.mxu1 %v2598_v13  ;;  %1874 = vmatprep.subr.bf16.mxu0 %v2599_v20  ;;  %v2443_v13 = vld [vmem:[#allocation2 + $0xf0] sm:$0xff]   ;;  %v2444_v20 = vld [vmem:[#allocation2 + $0xe8] sm:$0xff]  }
 0x8be   :  { %1834 = vmatpush1.bf16.msra.mxu1 %v2600_v21  ;;  %1875 = vmatpush1.bf16.msra.mxu0 %v2601_v23  ;;  %v2445_v21 = vld [vmem:[#allocation2 + $0xe0] sm:$0xff]   ;;  %v2447_v23 = vld [vmem:[#allocation2 + $0xd0] sm:$0xff]  }
 0x8bf   :  { %1835 = vmatprep.subr.bf16.mxu1 %v2602_v24  ;;  %1876 = vmatprep.subr.bf16.mxu0 %v2603_v26  ;;  %v2448_v24 = vld [vmem:[#allocation2 + $0xc8] sm:$0xff]   ;;  %v2449_v26 = vld [vmem:[#allocation2 + $0xc0] sm:$0xff]  }
 0x8c2   :  { %1836 = vmatpush1.bf16.msra.mxu1 %v2604_v27  ;;  %1877 = vmatpush1.bf16.msra.mxu0 %v2605_v28 }
 0x8c3   :  { %1837 = vmatprep.subr.bf16.mxu1 %v2606_v29  ;;  %1878 = vmatprep.subr.bf16.mxu0 %v2607_v30 }
 0x8c6   :  { %1838 = vmatpush1.bf16.msra.mxu1 %v2608_v31  ;;  %1879 = vmatpush1.bf16.msra.mxu0 %v2609_v32 }
 0x8c7   :  { %1839 = vmatprep.subr.bf16.mxu1 %v2610_v33  ;;  %1880 = vmatprep.subr.bf16.mxu0 %v2611_v34 }
 0x8ca   :  { %1840 = vmatpush1.bf16.msra.mxu1 %v2612_v35  ;;  %1881 = vmatpush1.bf16.msra.mxu0 %v2613_v36 }
 0x8cb   :  { %2293 = vmatprep.subr.bf16.mxu1 %v2664_v0 }
 0x96d   :  { %v1724_v37 = vpop.f32.mrf.mxu1  ;;  %v1765_v38 = vpop.f32.mrf.mxu0 }
 0x96e   :  { %v1776_v39 = vrot.slane %v1724_v37, 2  ;;  %v1778_v11 = vrot.slane %v1765_v38, 2 }
 0x96f   :  { %v1726_v40 = vpop.f32.mrf.mxu1  ;;  %v1767_v41 = vpop.f32.mrf.mxu0 }
 0x970   :  { %v1784_v42 = vadd.f32 %v1776_v39, %v2890_v4  ;;  %v1777_v43 = vrot.slane %v1726_v40, 2  ;;  %v1779_v51 = vrot.slane %v1767_v41, 2  ;;  %v1786_v15 = vadd.f32 %v1778_v11, %v2905_v59 }
 0x971   :  { %v1728_v44 = vpop.f32.mrf.mxu1  ;;  %v1769_v45 = vpop.f32.mrf.mxu0 }
 0x972   :  { %v2182_v46 = vmul.f32 -1.442695, %v1784_v42  ;;  %v1785_v47 = vadd.f32 %v1777_v43, %v2892_v7  ;;  %v1787_v17 = vadd.f32 %v1779_v51, %v2900_v56 }
 0x973   :  { %v1729_v48 = vpop.f32.mrf.mxu1  ;;  %v1770_v49 = vpop.f32.mrf.mxu0 }
 0x974   :  { %2546 = vpow2.f32 %v2182_v46  ;;  %v2183_v50 = vmul.f32 -1.442695, %v1785_v47  ;;  %v2184_v12 = vmul.f32 -1.442695, %v1787_v17 }
 0x976   :  { %2548 = vpow2.f32 %v2183_v50 }
 0x977   :  { %2550 = vpow2.f32 %v2184_v12 }
 0x981   :  { %v2547_v57 = vpop.eup %2546 }
 0x982   :  { %v1791_v55 = vadd.f32 1.0, %v2547_v57  ;;  %v1953_v57 = vsub.s32 7, %v2879_v61 }
 0x983   :  { %v2549_v8 = vpop.eup %2548 }
 0x984   :  { %2552 = vrcp.f32 %v1791_v55  ;;  %v1797_v16 = vadd.f32 1.0, %v2549_v8  ;;  %v2551_v5 = vpop.eup %2550 }
 0x985   :  { %2554 = vtanh.f32 %v1786_v15  ;;  %v1804_v14 = vadd.f32 1.0, %v2551_v5 }
 0x986   :  { %2556 = vrcp.f32 %v1797_v16 }
 0x987   :  { %2558 = vrcp.f32 %v1804_v14 }
 0x991   :  { %v2553_v1 = vpop.eup %2552 }
 0x992   :  { %v2555_v9 = vpop.eup %2554 }
 0x993   :  { %v2557_v19 = vpop.eup %2556  ;;  %v1811_v60 = vmul.f32 %v2555_v9, %v2553_v1  ;;  %v3203_v1 = vlaneseq }
 0x994   :  { %v1810_v63 = vmul.f32 %v2557_v19, %v1808_v58  ;;  %v2559_v54 = vpop.eup %2558  ;;  %v2188_v58 = vld [vmem:[%s3200_s3 + $0x3] ss:$0 sm:$0xff] }
 0x995   :  { %v2052_v9 = vand.u32 127, %v3203_v1 }
 0x996   :  { %v3162_v6 = vadd.f32 %v1811_v60, %v1810_v63 }
 0x997   :  { %vm2053_vm9 = vcmp.lt.s32.totalorder %v2052_v9, 8 }
 0x998   :  { %2560 = vtanh.f32 %v3162_v6  ;;  %v1943_v50 = vrot.slane %v3162_v6, 7 }
 0x9a5   :  { %v2561_v22 = vpop.eup %2560 }
 0x9a6   :  { %v1814_v2 = vmul.f32 %v2561_v22, %v2559_v54 }
 0x9a8   :  { %v1819_v62 = vrot.slane %v1814_v2, %v1818_v53  ;;  %v1821_v52 = vpack.c.bf16 %v1814_v2, %v1814_v2 }
 0x9aa   :  { %v1823_v25 = vrot.slane %v1821_v52, 3  ;;  %v3168_v3 = vsel %vm1815_vm7, %v1819_v62, %v3152_v18  ;;  %v2446_v18 = vld [vmem:[#allocation2 + $0xd8] sm:$0xff]  }
 0x9ac   :  { %1858 = vmatmul.mubr.bf16.vlgmr.msra.gmra.mxu1 %v1823_v25  ;;  %1899 = vmatmul.mubr.bf16.vlgmr.msra.gmra.mxu0 %v1823_v25 }
 0x9ad   :  { %2309 = vmatprep.mubr.msk.bf16.mxu1 %vm2665_vm0, %v2664_v0  ;;  %2294 = vmatpush3.bf16.msra.mxu1 %v2442_v10 }
 0x9ae   :  { %2295 = vmatprep.subr.bf16.mxu1 %v2664_v0 }
 0x9b1   :  { %2296 = vmatpush3.bf16.msra.mxu1 %v2443_v13 }
 0x9b2   :  { %2297 = vmatprep.subr.bf16.mxu1 %v2664_v0 }
 0x9b5   :  { %2298 = vmatpush3.bf16.msra.mxu1 %v2444_v20 }
 0x9b6   :  { %2299 = vmatprep.subr.bf16.mxu1 %v2664_v0 }
 0x9b9   :  { %2300 = vmatpush3.bf16.msra.mxu1 %v2445_v21 }
 0x9ba   :  { %2301 = vmatprep.subr.bf16.mxu1 %v2664_v0 }
 0x9bd   :  { %2302 = vmatpush3.bf16.msra.mxu1 %v2446_v18 }
 0x9be   :  { %2303 = vmatprep.subr.bf16.mxu1 %v2664_v0 }
 0x9c1   :  { %2304 = vmatpush3.bf16.msra.mxu1 %v2447_v23 }
 0x9c2   :  { %2305 = vmatprep.subr.bf16.mxu1 %v2664_v0 }
 0x9c5   :  { %2306 = vmatpush3.bf16.msra.mxu1 %v2448_v24 }
 0x9c6   :  { %2307 = vmatprep.subr.bf16.mxu1 %v2664_v0 }
 0x9c9   :  { %2308 = vmatpush3.bf16.msra.mxu1 %v2449_v26 }
 0xa6c   :  { %v1859_v27 = vpop.f32.mrf.mxu1  ;;  %v1900_v28 = vpop.f32.mrf.mxu0 }
 0xa6d   :  { %v1911_v29 = vrot.slane %v1859_v27, 1  ;;  %v1913_v42 = vrot.slane %v1900_v28, 1 }
 0xa6e   :  { %v1861_v30 = vpop.f32.mrf.mxu1  ;;  %v1902_v31 = vpop.f32.mrf.mxu0 }
 0xa6f   :  { %v1919_v32 = vadd.f32 %v1911_v29, %v2890_v4  ;;  %v1912_v33 = vrot.slane %v1861_v30, 1  ;;  %v1914_v0 = vrot.slane %v1902_v31, 1  ;;  %v1921_v45 = vadd.f32 %v1913_v42, %v2905_v59 }
 0xa70   :  { %v1863_v34 = vpop.f32.mrf.mxu1  ;;  %v1904_v35 = vpop.f32.mrf.mxu0 }
 0xa71   :  { %v2185_v36 = vmul.f32 -1.442695, %v1919_v32  ;;  %v1920_v37 = vadd.f32 %v1912_v33, %v2892_v7  ;;  %v1922_v41 = vadd.f32 %v1914_v0, %v2900_v56 }
 0xa72   :  { %v1864_v38 = vpop.f32.mrf.mxu1  ;;  %v1905_v39 = vpop.f32.mrf.mxu0 }
 0xa73   :  { %2562 = vpow2.f32 %v2185_v36  ;;  %v2186_v40 = vmul.f32 -1.442695, %v1920_v37  ;;  %v2187_v43 = vmul.f32 -1.442695, %v1922_v41 }
 0xa75   :  { %2564 = vpow2.f32 %v2186_v40 }
 0xa76   :  { %2566 = vpow2.f32 %v2187_v43 }
 0xa80   :  { %v2563_v44 = vpop.eup %2562 }
 0xa81   :  { %v1926_v4 = vadd.f32 1.0, %v2563_v44 }
 0xa82   :  { %v2565_v46 = vpop.eup %2564 }
 0xa83   :  { %2568 = vrcp.f32 %v1926_v4  ;;  %v1932_v47 = vadd.f32 1.0, %v2565_v46  ;;  %v2567_v7 = vpop.eup %2566 }
 0xa84   :  { %2570 = vtanh.f32 %v1921_v45  ;;  %v1939_v17 = vadd.f32 1.0, %v2567_v7 }
 0xa85   :  { %2572 = vrcp.f32 %v1932_v47 }
 0xa86   :  { %2574 = vrcp.f32 %v1939_v17 }
 0xa90   :  { %v2569_v48 = vpop.eup %2568 }
 0xa91   :  { %v2571_v49 = vpop.eup %2570 }
 0xa92   :  { %v2573_v51 = vpop.eup %2572  ;;  %v1946_v56 = vmul.f32 %v2571_v49, %v2569_v48 }
 0xa93   :  { %v1945_v11 = vmul.f32 %v2573_v51, %v1943_v50  ;;  %v2575_v59 = vpop.eup %2574 }
 0xa95   :  { %v1947_v12 = vadd.f32 %v1946_v56, %v1945_v11 }
 0xa97   :  { %2576 = vtanh.f32 %v1947_v12 }
 0xaa4   :  { %v2577_v15 = vpop.eup %2576 }
 0xaa5   :  { %v1949_v55 = vmul.f32 %v2577_v15, %v2575_v59 }
 0xaa7   :  { %v1954_v8 = vrot.slane %v1949_v55, %v1953_v57 }
 0xaa9   :  { %v1955_v16 = vsel %vm1950_vm8, %v1954_v8, %v3168_v3 }
 0xaaa   :  { %v1956_v5 = vpack.c.bf16 %v1955_v16, %v1955_v16 }
 0xaac   :  { %2310 = vmatmul.mubr.bf16.vlgmr.msra.gmra.mxu1 %v1956_v5 }
 0xb6c   :  { %v2045_v19 = vpop.f32.mrf.mxu1 }
 0xb6d   :  { %v2046_v14 = vadd.f32 %v2188_v58, %v2045_v19 }
 0xb6e   :  { %v2311_v60 = vpop.f32.mrf.mxu1 }
 0xb6f   :  { %v2054_v63 = vsel %vm2053_vm9, %v2046_v14, -1e+30 }
 0xb70   :  { %2055 = vmax.xlane.f32.xlu0 %v2054_v63  ;;  %v2048_v6 = vpop.f32.mrf.mxu1 }
 0xb72   :  { %v2312_v61 = vpop.f32.mrf.mxu1 }
 0xbf9   :  { %v2056_v54 = vpop.xlane.xlu0 %2055 }
 0xbfa   :  { %v2057_v53 = vsub.f32 %v2054_v63, %v2056_v54 }
 0xbfc   :  { %v2058_v22 = vmul.f32 1.442695, %v2057_v53 }
 0xbfe   :  { %2578 = vpow2.f32 %v2058_v22 }
 0xc0b   :  { %v2579_v2 = vpop.eup %2578 }
 0xc0c   :  { %v2060_v62 = vsel %vm2053_vm9, %v2579_v2, 0.0 }
 0xc0d   :  { %2061 = vadd.xlane.f32.xlu0 %v2060_v62 }
 0xc96   :  { %v2062_v52 = vpop.xlane.xlu0 %2061 }
 0xc97   :  { %2580 = vrcp.f32 %v2062_v52 }
 0xca4   :  { %v2581_v25 = vpop.eup %2580 }
 0xca5   :  { %v2064_v3 = vmul.f32 %v2581_v25, %v2060_v62 }
 0xca7   :  { %v2065_v10 = vsel %vm2053_vm9, %v2064_v3, %v2046_v14 }
 0xca8   :  { %2066 = vst [vmem:[%s3201_s4] sm:$0xff] %v2065_v10 }
 0xca9   :  { %2071 = vsyncpa [#allocation3], 1 }
 0xcaa   :  { %2072 = vsyncpa [#allocation5], 1 }

</bundles_post_ra>
